<compile_context>
chip_gen: v6e
topology: v6e:2x2x1
jax: 0.10.0
libtpu: 0.0.40
codegen_flags: <defaults>
</compile_context>

<pallas_src>
import jax
import jax.numpy as jnp
from jax.experimental import pallas as pl
from jax.experimental.pallas import tpu as pltpu


def _round_up(x, m):
    return ((x + m - 1) // m) * m


def _select_layer4_tiling(out_dim):
    """Per-generation layer-4 output tile / VMEM budget."""
    try:
        vmem_bytes = pltpu.get_tpu_info().vmem_capacity_bytes
    except Exception:
        vmem_bytes = 64 * 1024 * 1024            # conservative fallback
    if vmem_bytes >= 100 * 1024 * 1024:          # v5e / v6e (128 MiB VMEM)
        tn, vmem_limit = 8192, 96 * 1024 * 1024
    else:                                        # v7x (64 MiB VMEM per TC)
        tn, vmem_limit = 4096, 52 * 1024 * 1024
    return min(tn, out_dim), vmem_limit


# ----------------------------------------------------------------------------
# Pass 1: fused layers 1-3 (small, compute-light). Grid = (batch tiles,).
# ----------------------------------------------------------------------------
def hidden_layers_kernel(x_ref, w1_ref, b1_ref, w2_ref, b2_ref,
                         w3_ref, b3_ref, h3_ref):
    h = jnp.dot(x_ref[...], w1_ref[...],
                preferred_element_type=jnp.float32) + b1_ref[...]
    h = jnp.maximum(h, 0.0).astype(jnp.bfloat16)                 # ReLU
    h = jnp.dot(h, w2_ref[...],
                preferred_element_type=jnp.float32) + b2_ref[...]
    h = jnp.maximum(h, 0.0).astype(jnp.bfloat16)                 # ReLU
    h = jnp.dot(h, w3_ref[...],
                preferred_element_type=jnp.float32) + b3_ref[...]
    h3_ref[...] = jnp.maximum(h, 0.0).astype(jnp.bfloat16)       # ReLU


# ----------------------------------------------------------------------------
# Pass 2: layer 4 (HBM-bandwidth-bound on W4). Grid = (N tiles, batch tiles);
# W4/b4 blocks depend only on the outer axis -> each W4 tile DMA'd once.
# ----------------------------------------------------------------------------
def output_layer_kernel(h3_ref, w4_ref, b4_ref, o_ref):
    h4 = jnp.dot(h3_ref[...], w4_ref[...],
                 preferred_element_type=jnp.float32) + b4_ref[...]
    o_ref[...] = jnp.tanh(h4).astype(o_ref.dtype)                # Tanh


# ----------------------------------------------------------------------------
# Wrapper: concat (torch.cat dim=1), padding, two pallas_calls, view.
# ----------------------------------------------------------------------------
def generator_forward(noise, conditions, params, img_channels, img_size,
                      *, max_batch_tile=512, out_dtype=jnp.bfloat16):
    (w1, b1), (w2, b2), (w3, b3), (w4, b4) = params
    k_pad = w1.shape[0]                       # layer-1 K, already padded to 128x
    f1, f2, f3 = w1.shape[1], w2.shape[1], w3.shape[1]
    out_dim = img_channels * img_size * img_size
    assert w4.shape == (f3, out_dim)

    # Glue: torch.cat((noise, conditions), dim=1)
    x = jnp.concatenate([noise, conditions], axis=1)
    B, K = x.shape

    # Batch tiling: minimize padded rows (<= 7) while capping the tile size.
    nb = pl.cdiv(B, max_batch_tile)
    TB = _round_up(pl.cdiv(B, nb), 8)
    padded_B = nb * TB

    TN, vmem_limit = _select_layer4_tiling(out_dim)
    nn = pl.cdiv(out_dim, TN)

    # Zero-pad: rows to nb*TB, features to the padded K of W1; cast to bf16.
    x = jnp.pad(x, ((0, padded_B - B), (0, k_pad - K))).astype(jnp.bfloat16)

    # -------- Pass 1: H3 = ReLU(L3(ReLU(L2(ReLU(L1(x)))))), bf16 ------------
    h3 = pl.pallas_call(
        hidden_layers_kernel,
        out_shape=jax.ShapeDtypeStruct((padded_B, f3), jnp.bfloat16),
        grid_spec=pltpu.PrefetchScalarGridSpec(
            num_scalar_prefetch=0,
            grid=(nb,),
            in_specs=[
                pl.BlockSpec((TB, k_pad), lambda i: (i, 0)),  # x (per batch tile)
                pl.BlockSpec((k_pad, f1), lambda i: (0, 0)),  # w1 (VMEM-resident)
                pl.BlockSpec((1, f1),     lambda i: (0, 0)),  # b1
                pl.BlockSpec((f1, f2),    lambda i: (0, 0)),  # w2 (VMEM-resident)
                pl.BlockSpec((1, f2),     lambda i: (0, 0)),  # b2
                pl.BlockSpec((f2, f3),    lambda i: (0, 0)),  # w3 (VMEM-resident)
                pl.BlockSpec((1, f3),     lambda i: (0, 0)),  # b3
            ],
            out_specs=pl.BlockSpec((TB, f3), lambda i: (i, 0)),
        ),
        compiler_params=pltpu.CompilerParams(
            dimension_semantics=("parallel",)),
    )(x, w1, b1, w2, b2, w3, b3)

    # -------- Pass 2: out = tanh(H3 @ W4 + b4), W4 streamed once ------------
    out_itemsize = jnp.dtype(out_dtype).itemsize
    cost = pl.CostEstimate(
        flops=2 * padded_B * f3 * out_dim,
        transcendentals=padded_B * out_dim,
        bytes_accessed=(w4.size * w4.dtype.itemsize
                        + out_dim * b4.dtype.itemsize
                        + nn * padded_B * f3 * 2
                        + padded_B * out_dim * out_itemsize),
    )

    flat = pl.pallas_call(
        output_layer_kernel,
        out_shape=jax.ShapeDtypeStruct((padded_B, out_dim), out_dtype),
        grid_spec=pltpu.PrefetchScalarGridSpec(
            num_scalar_prefetch=0,
            grid=(nn, nb),
            in_specs=[
                pl.BlockSpec((TB, f3), lambda j, i: (i, 0)),  # H3 (small, re-read)
                pl.BlockSpec((f3, TN), lambda j, i: (0, j)),  # W4 tile: once per j
                pl.BlockSpec((1, TN),  lambda j, i: (0, j)),  # b4 tile
            ],
            out_specs=pl.BlockSpec((TB, TN), lambda j, i: (i, j)),
        ),
        compiler_params=pltpu.CompilerParams(
            dimension_semantics=("parallel", "parallel"),
            vmem_limit_bytes=vmem_limit,
        ),
        cost_estimate=cost,
    )(h3, w4, b4)

    # Glue: drop padded rows, then PyTorch `.view(B, C, H, W)` (NCHW).
    return flat[:B].reshape(B, img_channels, img_size, img_size)


# ----------------------------------------------------------------------------
# Parameter init (PyTorch-Linear-style uniform(-1/sqrt(fan_in))).
# Weights stored as (in_features, out_features) in bf16 (halves HBM traffic);
# layer-1 rows zero-padded to a multiple of 128. Biases kept in f32.
# ----------------------------------------------------------------------------
def init_params(key, in_dim, out_dim, pad_in_to=None):
    kw, kb = jax.random.split(key)
    bound = 1.0 / jnp.sqrt(jnp.float32(in_dim))
    w = jax.random.uniform(kw, (in_dim, out_dim), jnp.float32, -bound, bound)
    if pad_in_to is not None and pad_in_to > in_dim:
        w = jnp.pad(w, ((0, pad_in_to - in_dim), (0, 0)))
    b = jax.random.uniform(kb, (1, out_dim), jnp.float32, -bound, bound)
    return w.astype(jnp.bfloat16), b


def make_generator_params(key, latent_dim, condition_dim, img_channels, img_size):
    in_dim = latent_dim + condition_dim
    dims = [in_dim, 256, 512, 1024, img_channels * img_size * img_size]
    keys = jax.random.split(key, 4)
    params = [init_params(keys[0], dims[0], dims[1],
                          pad_in_to=_round_up(dims[0], 128))]
    params += [init_params(keys[i], dims[i], dims[i + 1]) for i in range(1, 4)]
    return params


# ----------------------------------------------------------------------------
# Pure-JAX reference (same bf16 weights / f32 accumulation) for checking.
# ----------------------------------------------------------------------------
def generator_forward_ref(noise, conditions, params, img_channels, img_size):
    (w1, b1), (w2, b2), (w3, b3), (w4, b4) = params
    x = jnp.concatenate([noise, conditions], axis=1)
    B, K = x.shape
    x = jnp.pad(x, ((0, 0), (0, w1.shape[0] - K))).astype(jnp.bfloat16)
    h = jnp.maximum(jnp.dot(x, w1, preferred_element_type=jnp.float32) + b1, 0.0)
    h = jnp.maximum(jnp.dot(h.astype(jnp.bfloat16), w2,
                            preferred_element_type=jnp.float32) + b2, 0.0)
    h = jnp.maximum(jnp.dot(h.astype(jnp.bfloat16), w3,
                            preferred_element_type=jnp.float32) + b3, 0.0)
    h = jnp.tanh(jnp.dot(h.astype(jnp.bfloat16), w4,
                         preferred_element_type=jnp.float32) + b4)
    return h.reshape(B, img_channels, img_size, img_size)


if __name__ == "__main__":
    # Small shapes consistent with the module's forward.
    batch = 2
    latent_dim = 32
    condition_dim = 1
    img_channels = 3
    img_size = 16

    key = jax.random.PRNGKey(0)
    k_noise, k_cond, k_params = jax.random.split(key, 3)

    noise = jax.random.normal(k_noise, (batch, latent_dim), jnp.float32)
    conditions = jax.random.normal(k_cond, (batch, condition_dim), jnp.float32)
    params = make_generator_params(k_params, latent_dim, condition_dim,
                                   img_channels, img_size)

    out = generator_forward(noise, conditions, params, img_channels, img_size)
    out = jax.block_until_ready(out)

    ref = generator_forward_ref(noise, conditions, params, img_channels, img_size)
    assert out.shape == (batch, img_channels, img_size, img_size)
    # Kernel output is bf16 (tanh in [-1,1]; ~4e-3 quantization) vs f32 ref.
    err = float(jnp.max(jnp.abs(out.astype(jnp.float32) - ref)))
    assert err < 1e-2, err

    print("KERNEL_OK")
</pallas_src>

<mosaic_0001>
module attributes {stable_mosaic.version = 11 : i64} {
  func.func @hidden_layers_kernel(%arg0: i32, %arg1: memref<8x128xbf16, #tpu.memory_space<vmem>>, %arg2: memref<128x256xbf16, #tpu.memory_space<vmem>>, %arg3: memref<1x256xf32, #tpu.memory_space<vmem>>, %arg4: memref<256x512xbf16, #tpu.memory_space<vmem>>, %arg5: memref<1x512xf32, #tpu.memory_space<vmem>>, %arg6: memref<512x1024xbf16, #tpu.memory_space<vmem>>, %arg7: memref<1x1024xf32, #tpu.memory_space<vmem>>, %arg8: memref<8x1024xbf16, #tpu.memory_space<vmem>>) attributes {dimension_semantics = [#tpu.dimension_semantics<parallel>], iteration_bounds = array<i64: 1>, scalar_prefetch = 0 : i64, scratch_operands = 0 : i64, tpu.core_type = #tpu.core_type<tc>, window_params = [{transform_indices = @transform_0, window_bounds = array<i64: 8, 128>}, {pipeline_mode = #tpu.pipeline_mode<synchronous>, transform_indices = @transform_1, window_bounds = array<i64: 128, 256>}, {pipeline_mode = #tpu.pipeline_mode<synchronous>, transform_indices = @transform_2, window_bounds = array<i64: 1, 256>}, {pipeline_mode = #tpu.pipeline_mode<synchronous>, transform_indices = @transform_3, window_bounds = array<i64: 256, 512>}, {pipeline_mode = #tpu.pipeline_mode<synchronous>, transform_indices = @transform_4, window_bounds = array<i64: 1, 512>}, {pipeline_mode = #tpu.pipeline_mode<synchronous>, transform_indices = @transform_5, window_bounds = array<i64: 512, 1024>}, {pipeline_mode = #tpu.pipeline_mode<synchronous>, transform_indices = @transform_6, window_bounds = array<i64: 1, 1024>}, {transform_indices = @transform_7, window_bounds = array<i64: 8, 1024>}]} {
    %c0 = arith.constant 0 : index
    %c0_0 = arith.constant 0 : index
    %0 = vector.load %arg1[%c0, %c0_0] : memref<8x128xbf16, #tpu.memory_space<vmem>>, vector<8x128xbf16>
    %c0_1 = arith.constant 0 : index
    %c0_2 = arith.constant 0 : index
    %1 = vector.load %arg2[%c0_1, %c0_2] : memref<128x256xbf16, #tpu.memory_space<vmem>>, vector<128x256xbf16>
    %cst = arith.constant dense<0.000000e+00> : vector<8x256xf32>
    %2 = tpu.matmul %0, %1, %cst {dimension_numbers = #tpu.dot_dimension_numbers<[1], [0], [0], [1], [0, 0, 1, 1], [], []>} : vector<8x128xbf16>, vector<128x256xbf16>, vector<8x256xf32> -> vector<8x256xf32>
    %c0_3 = arith.constant 0 : index
    %c0_4 = arith.constant 0 : index
    %3 = vector.load %arg3[%c0_3, %c0_4] : memref<1x256xf32, #tpu.memory_space<vmem>>, vector<1x256xf32>
    %4 = vector.broadcast %3 : vector<1x256xf32> to vector<8x256xf32>
    %5 = arith.addf %2, %4 : vector<8x256xf32>
    %cst_5 = arith.constant 0.000000e+00 : f32
    %6 = vector.broadcast %cst_5 : f32 to vector<8x256xf32>
    %7 = arith.maximumf %5, %6 : vector<8x256xf32>
    %8 = arith.truncf %7 : vector<8x256xf32> to vector<8x256xbf16>
    %c0_6 = arith.constant 0 : index
    %c0_7 = arith.constant 0 : index
    %9 = vector.load %arg4[%c0_6, %c0_7] : memref<256x512xbf16, #tpu.memory_space<vmem>>, vector<256x512xbf16>
    %cst_8 = arith.constant dense<0.000000e+00> : vector<8x512xf32>
    %10 = tpu.matmul %8, %9, %cst_8 {dimension_numbers = #tpu.dot_dimension_numbers<[1], [0], [0], [1], [0, 0, 1, 1], [], []>} : vector<8x256xbf16>, vector<256x512xbf16>, vector<8x512xf32> -> vector<8x512xf32>
    %c0_9 = arith.constant 0 : index
    %c0_10 = arith.constant 0 : index
    %11 = vector.load %arg5[%c0_9, %c0_10] : memref<1x512xf32, #tpu.memory_space<vmem>>, vector<1x512xf32>
    %12 = vector.broadcast %11 : vector<1x512xf32> to vector<8x512xf32>
    %13 = arith.addf %10, %12 : vector<8x512xf32>
    %cst_11 = arith.constant 0.000000e+00 : f32
    %14 = vector.broadcast %cst_11 : f32 to vector<8x512xf32>
    %15 = arith.maximumf %13, %14 : vector<8x512xf32>
    %16 = arith.truncf %15 : vector<8x512xf32> to vector<8x512xbf16>
    %c0_12 = arith.constant 0 : index
    %c0_13 = arith.constant 0 : index
    %17 = vector.load %arg6[%c0_12, %c0_13] : memref<512x1024xbf16, #tpu.memory_space<vmem>>, vector<512x1024xbf16>
    %cst_14 = arith.constant dense<0.000000e+00> : vector<8x1024xf32>
    %18 = tpu.matmul %16, %17, %cst_14 {dimension_numbers = #tpu.dot_dimension_numbers<[1], [0], [0], [1], [0, 0, 1, 1], [], []>} : vector<8x512xbf16>, vector<512x1024xbf16>, vector<8x1024xf32> -> vector<8x1024xf32>
    %c0_15 = arith.constant 0 : index
    %c0_16 = arith.constant 0 : index
    %19 = vector.load %arg7[%c0_15, %c0_16] : memref<1x1024xf32, #tpu.memory_space<vmem>>, vector<1x1024xf32>
    %20 = vector.broadcast %19 : vector<1x1024xf32> to vector<8x1024xf32>
    %21 = arith.addf %18, %20 : vector<8x1024xf32>
    %cst_17 = arith.constant 0.000000e+00 : f32
    %22 = vector.broadcast %cst_17 : f32 to vector<8x1024xf32>
    %23 = arith.maximumf %21, %22 : vector<8x1024xf32>
    %24 = arith.truncf %23 : vector<8x1024xf32> to vector<8x1024xbf16>
    %c0_18 = arith.constant 0 : index
    %c0_19 = arith.constant 0 : index
    %25 = vector.load %arg8[%c0_18, %c0_19] : memref<8x1024xbf16, #tpu.memory_space<vmem>>, vector<8x1024xbf16>
    tpu.vector_store %arg8[%c0_18, %c0_19], %24 {strides = array<i32>} : memref<8x1024xbf16, #tpu.memory_space<vmem>>, vector<8x1024xbf16>,
    return
  }
  func.func @transform_0(%arg0: i32) -> (i32, i32) {
    %c0_i32 = arith.constant 0 : i32
    %c0_i32_0 = arith.constant 0 : i32
    return %arg0, %c0_i32 : i32, i32
  }
  func.func @transform_1(%arg0: i32) -> (i32, i32) {
    %c0_i32 = arith.constant 0 : i32
    %c0_i32_0 = arith.constant 0 : i32
    %c0_i32_1 = arith.constant 0 : i32
    return %c0_i32, %c0_i32_0 : i32, i32
  }
  func.func @transform_2(%arg0: i32) -> (i32, i32) {
    %c0_i32 = arith.constant 0 : i32
    %c0_i32_0 = arith.constant 0 : i32
    %c0_i32_1 = arith.constant 0 : i32
    return %c0_i32, %c0_i32_0 : i32, i32
  }
  func.func @transform_3(%arg0: i32) -> (i32, i32) {
    %c0_i32 = arith.constant 0 : i32
    %c0_i32_0 = arith.constant 0 : i32
    %c0_i32_1 = arith.constant 0 : i32
    return %c0_i32, %c0_i32_0 : i32, i32
  }
  func.func @transform_4(%arg0: i32) -> (i32, i32) {
    %c0_i32 = arith.constant 0 : i32
    %c0_i32_0 = arith.constant 0 : i32
    %c0_i32_1 = arith.constant 0 : i32
    return %c0_i32, %c0_i32_0 : i32, i32
  }
  func.func @transform_5(%arg0: i32) -> (i32, i32) {
    %c0_i32 = arith.constant 0 : i32
    %c0_i32_0 = arith.constant 0 : i32
    %c0_i32_1 = arith.constant 0 : i32
    return %c0_i32, %c0_i32_0 : i32, i32
  }
  func.func @transform_6(%arg0: i32) -> (i32, i32) {
    %c0_i32 = arith.constant 0 : i32
    %c0_i32_0 = arith.constant 0 : i32
    %c0_i32_1 = arith.constant 0 : i32
    return %c0_i32, %c0_i32_0 : i32, i32
  }
  func.func @transform_7(%arg0: i32) -> (i32, i32) {
    %c0_i32 = arith.constant 0 : i32
    %c0_i32_0 = arith.constant 0 : i32
    return %arg0, %c0_i32 : i32, i32
  }
}

</mosaic_0001>

<bundles_post_ra>
// kernel: tpu_custom_call.1
= control target key start
LH: loop header
LB: loop body
LE: loop exit
PB: predicated region body
PF: predicated region fallthrough
CT: control target
= control target key end

     0   :  { %12 = vsyncpa [#allocation3], 0  ;;  %s3453_s0 = inlined_call_operand.hbm [shape: bf16[8,128], index: 0, kind: input, shape index: {}]   ;;  %s3454_s1 = inlined_call_operand.hbm [shape: bf16[128,256], index: 1, kind: input, shape index: {}]   ;;  %s3455_s2 = inlined_call_operand.vmem [shape: f32[1,256], index: 2, kind: input, shape index: {}]   ;;  %s3456_s3 = inlined_call_operand.hbm [shape: bf16[256,512], index: 3, kind: input, shape index: {}]   ;;  %s3457_s4 = inlined_call_operand.hbm [shape: f32[1,512], index: 4, kind: input, shape index: {}]   ;;  %s3458_s5 = inlined_call_operand.hbm [shape: bf16[512,1024], index: 5, kind: input, shape index: {}]   ;;  %s3459_s6 = inlined_call_operand.vmem [shape: f32[1,1024], index: 6, kind: input, shape index: {}]   ;;  %s3460_s7 = inlined_call_operand.hbm [shape: bf16[8,1024], index: 7, kind: output, shape index: {}]  }
   0x1   :  { %13 = vsyncpa [#allocation6], 0 }
   0x2   :  { %14 = vsyncpa [#allocation9], 0 }
   0x3   :  { %15 = vsyncpa [#allocation4], 0  ;;  %s3314_s24 = smov [#allocation5]  }
   0x4   :  { %s31_s25 = sshll.u32 %s3314_s24, 4  ;;  %s32_s25 = int_to_ptr.vmem [resolvable:$true] %s31_s25 }
   0x5   :  { %s3194_s26 = scalar_lea.vmem %s32_s25, 2048  ;;  %p3199_p1 = scmp.lt.s32.totalorder %s32_s25, %s32_s25 }
   0x6   :  { %p3195_p0 = scmp.ne.s32.totalorder %s32_s25, %s3194_s26  ;;  %p3200_p2 = scmp.lt.s32.totalorder %s3194_s26, %s3194_s26 }
   0x8   :  { %p3201_p3 = por %p3200_p2, %p3199_p1 }
   0xa   :  { %p3202_p4 = pnand %p3201_p3, %p3195_p0 }
   0xc   :  { %3205 = shalt.err (!%p3202_p4)
}
   0xd   :  { %s3315_s27 = smov 128   ;;  %s3316_s28 = smov 8  }
   0xe   :  { %37 = dma.hbm_to_vmem [thread:$0]  %s3454_s1, 2048, %s32_s25, [#allocation6], %s3315_s27, %s3315_s27, %s3316_s28  }
   0xf   :  { %s3317_s8 = smov [#allocation8]   ;;  %s3318_s10 = smov [#allocation2]  }
  0x10   :  { %s58_s9 = sshll.u32 %s3317_s8, 4  ;;  %s22_s11 = sshll.u32 %s3318_s10, 4  ;;  %s59_s9 = int_to_ptr.vmem [resolvable:$true] %s58_s9  ;;  %s23_s11 = int_to_ptr.vmem [resolvable:$true] %s22_s11 }
  0x11   :  { %s3214_s12 = scalar_lea.vmem %s59_s9, 64  ;;  %p3219_p6 = scmp.lt.s32.totalorder %s59_s9, %s59_s9 }
  0x12   :  { %p3215_p5 = scmp.ne.s32.totalorder %s59_s9, %s3214_s12  ;;  %p3220_p7 = scmp.lt.s32.totalorder %s3214_s12, %s3214_s12 }
  0x14   :  { %p3221_p8 = por %p3220_p7, %p3219_p6 }
  0x16   :  { %p3222_p9 = pnand %p3221_p8, %p3215_p5 }
  0x18   :  { %3225 = shalt.err (!%p3222_p9)
}
  0x19   :  { %61 = dma.hbm_to_vmem [thread:$0]  %s3457_s4, 64, %s59_s9, [#allocation9]  }
  0x1a   :  { %s3234_s15 = scalar_lea.vmem %s23_s11, 64  ;;  %p3239_p11 = scmp.lt.s32.totalorder %s23_s11, %s23_s11 }
  0x1b   :  { %p3235_p10 = scmp.ne.s32.totalorder %s23_s11, %s3234_s15  ;;  %p3240_p12 = scmp.lt.s32.totalorder %s3234_s15, %s3234_s15 }
  0x1d   :  { %p3241_p13 = por %p3240_p12, %p3239_p11 }
  0x1f   :  { %p3242_p0 = pnand %p3241_p13, %p3235_p10 }
  0x21   :  { %3245 = shalt.err (!%p3242_p0)
}
  0x22   :  { %25 = dma.hbm_to_vmem [thread:$0]  %s3453_s0, 64, %s23_s11, [#allocation3]  }
  0x23   :  { %s3319_s17 = smov [#allocation7]  }
  0x24   :  { %s45_s18 = sshll.u32 %s3319_s17, 4  ;;  %s46_s18 = int_to_ptr.vmem [resolvable:$true] %s45_s18 }
  0x25   :  { %s3254_s19 = scalar_lea.vmem %s46_s18, 8192  ;;  %p3259_p2 = scmp.lt.s32.totalorder %s46_s18, %s46_s18 }
  0x26   :  { %p3255_p1 = scmp.ne.s32.totalorder %s46_s18, %s3254_s19  ;;  %p3260_p3 = scmp.lt.s32.totalorder %s3254_s19, %s3254_s19 }
  0x28   :  { %p3261_p4 = por %p3260_p3, %p3259_p2 }
  0x2a   :  { %p3262_p5 = pnand %p3261_p4, %p3255_p1 }
  0x2c   :  { %3265 = shalt.err (!%p3262_p5)
}
  0x2d   :  { %s3320_s4 = smov 256   ;;  %s3321_s20 = smov 16  }
  0x2e   :  { %51 = dma.hbm_to_vmem [thread:$0]  %s3456_s3, 8192, %s46_s18, [#allocation6], %s3320_s4, %s3320_s4, %s3321_s20  }
  0x2f   :  { %s3322_s23 = smov [#allocation10]  }
  0x30   :  { %s67_s24 = sshll.u32 %s3322_s23, 4  ;;  %s68_s24 = int_to_ptr.vmem [resolvable:$true] %s67_s24 }
  0x31   :  { %s3274_s0 = scalar_lea.vmem %s68_s24, 32768  ;;  %p3279_p7 = scmp.lt.s32.totalorder %s68_s24, %s68_s24 }
  0x32   :  { %p3275_p6 = scmp.ne.s32.totalorder %s68_s24, %s3274_s0  ;;  %p3280_p8 = scmp.lt.s32.totalorder %s3274_s0, %s3274_s0 }
  0x34   :  { %p3281_p9 = por %p3280_p8, %p3279_p7 }
  0x36   :  { %p3282_p10 = pnand %p3281_p9, %p3275_p6 }
  0x38   :  { %3285 = shalt.err (!%p3282_p10)
}
  0x39   :  { %s3323_s25 = smov 512   ;;  %s3324_s26 = smov 32  }
  0x3a   :  { %73 = dma.hbm_to_vmem [thread:$0]  %s3458_s5, 32768, %s68_s24, [#allocation9], %s3323_s25, %s3323_s25, %s3324_s26  }
  0x3b   :  { %3306 = dma.done.wait [#allocation3], 64  }
  0x3c   :  { %3307 = vsyncadd [#allocation3], 4294967232 }
  0x3d   :  { %3308 = dma.done.wait [#allocation6], 10240  }
  0x3e   :  { %3309 = vsyncadd [#allocation6], 4294957056 }
  0x3f   :  { %3310 = dma.done.wait [#allocation9], 32832  }
  0x40   :  { %3311 = vsyncadd [#allocation9], 4294934464  ;;  %v3325_v0 = vmov 0   ;;  %v3066_v1 = vld [vmem:[#allocation5 + $0x74] ss:$8 sps:$4 sm:$0xff]  }
  0x41   :  { %233 = vmatprep.mubr.bf16.mxu0 %v3325_v0  ;;  %v3068_v2 = vld [vmem:[#allocation5 + $0x70] ss:$8 sps:$4 sm:$0xff]   ;;  %201 = vmatprep.subr.bf16.mxu0 %v3066_v1  ;;  %v3069_v3 = vld [vmem:[#allocation5 + $0x64] ss:$8 sps:$4 sm:$0xff]   ;;  %v3071_v4 = vld [vmem:[#allocation5 + $0x60] ss:$8 sps:$4 sm:$0xff]  }
  0x42   :  { %202 = vmatpush1.bf16.msra.mxu0 %v3068_v2  ;;  %v3072_v5 = vld [vmem:[#allocation5 + $0x54] ss:$8 sps:$4 sm:$0xff]   ;;  %v3074_v6 = vld [vmem:[#allocation5 + $0x50] ss:$8 sps:$4 sm:$0xff]   ;;  %v3075_v7 = vld [vmem:[#allocation5 + $0x44] ss:$8 sps:$4 sm:$0xff]  }
  0x43   :  { %203 = vmatprep.subr.bf16.mxu0 %v3069_v3  ;;  %v3077_v8 = vld [vmem:[#allocation5 + $0x40] ss:$8 sps:$4 sm:$0xff]   ;;  %v3090_v9 = vld [vmem:[#allocation7 + $0xe4] ss:$16 sps:$4 sm:$0xff]   ;;  %v3080_v13 = vld [vmem:[#allocation5 + $0x30] ss:$8 sps:$4 sm:$0xff]  }
  0x44   :  { %v3078_v10 = vld [vmem:[#allocation5 + $0x34] ss:$8 sps:$4 sm:$0xff]   ;;  %652 = vmatprep.subr.bf16.mxu1 %v3090_v9  ;;  %v3095_v11 = vld [vmem:[#allocation7 + $0xe0] ss:$16 sps:$4 sm:$0xff]   ;;  %v3081_v14 = vld [vmem:[#allocation5 + $0x24] ss:$8 sps:$4 sm:$0xff]  }
  0x45   :  { %v3096_v12 = vld [vmem:[#allocation7 + $0xc4] ss:$16 sps:$4 sm:$0xff]   ;;  %653 = vmatpush1.bf16.msra.mxu1 %v3095_v11  ;;  %v3101_v15 = vld [vmem:[#allocation7 + $0xc0] ss:$16 sps:$4 sm:$0xff]   ;;  %v3094_v26 = vld [vmem:[#allocation7 + $0xec] ss:$16 sps:$4 sm:$0xff]  }
  0x46   :  { %204 = vmatpush1.bf16.msra.mxu0 %v3071_v4  ;;  %654 = vmatprep.subr.bf16.mxu1 %v3096_v12  ;;  %v3102_v16 = vld [vmem:[#allocation7 + $0xa4] ss:$16 sps:$4 sm:$0xff]   ;;  %v3083_v17 = vld [vmem:[#allocation5 + $0x20] ss:$8 sps:$4 sm:$0xff]   ;;  %v3086_v21 = vld [vmem:[#allocation5 + $0x10] ss:$8 sps:$4 sm:$0xff]  }
  0x47   :  { %205 = vmatprep.subr.bf16.mxu0 %v3072_v5  ;;  %v3084_v18 = vld [vmem:[#allocation5 + $0x14] ss:$8 sps:$4 sm:$0xff]   ;;  %v3107_v19 = vld [vmem:[#allocation7 + $0xa0] ss:$16 sps:$4 sm:$0xff]   ;;  %v3087_v22 = vld [vmem:[#allocation5 + $0x4] ss:$8 sps:$4 sm:$0xff]  }
  0x48   :  { %v3108_v20 = vld [vmem:[#allocation7 + $0x84] ss:$16 sps:$4 sm:$0xff]   ;;  %v3113_v23 = vld [vmem:[#allocation7 + $0x80] ss:$16 sps:$4 sm:$0xff]   ;;  %v92_v29 = vld [vmem:[#allocation2] sm:$0xf] }
  0x49   :  { %655 = vmatpush1.bf16.msra.mxu1 %v3101_v15  ;;  %v3114_v24 = vld [vmem:[#allocation7 + $0x64] ss:$16 sps:$4 sm:$0xff]   ;;  %v3089_v25 = vld [vmem:[#allocation5] ss:$8 sps:$4 sm:$0xff]   ;;  %v3100_v31 = vld [vmem:[#allocation7 + $0xcc] ss:$16 sps:$4 sm:$0xff]  }
  0x4a   :  { %206 = vmatpush1.bf16.msra.mxu0 %v3074_v6  ;;  %656 = vmatprep.subr.bf16.mxu1 %v3102_v16  ;;  %v3119_v27 = vld [vmem:[#allocation7 + $0x60] ss:$16 sps:$4 sm:$0xff]   ;;  %v3120_v28 = vld [vmem:[#allocation7 + $0x44] ss:$16 sps:$4 sm:$0xff]   ;;  %v3092_v30 = vld [vmem:[#allocation7 + $0xe8] ss:$16 sps:$4 sm:$0xff]  }
  0x4b   :  { %207 = vmatprep.subr.bf16.mxu0 %v3075_v7  ;;  %v3125_v32 = vld [vmem:[#allocation7 + $0x40] ss:$16 sps:$4 sm:$0xff]   ;;  %v3126_v33 = vld [vmem:[#allocation7 + $0x24] ss:$16 sps:$4 sm:$0xff]   ;;  %v3098_v34 = vld [vmem:[#allocation7 + $0xc8] ss:$16 sps:$4 sm:$0xff]  }
  0x4c   :  { %v3106_v35 = vld [vmem:[#allocation7 + $0xac] ss:$16 sps:$4 sm:$0xff]   ;;  %v3131_v36 = vld [vmem:[#allocation7 + $0x20] ss:$16 sps:$4 sm:$0xff]   ;;  %v3132_v37 = vld [vmem:[#allocation7 + $0x4] ss:$16 sps:$4 sm:$0xff]  }
  0x4d   :  { %657 = vmatpush1.bf16.msra.mxu1 %v3107_v19  ;;  %v3104_v38 = vld [vmem:[#allocation7 + $0xa8] ss:$16 sps:$4 sm:$0xff]   ;;  %v3112_v39 = vld [vmem:[#allocation7 + $0x8c] ss:$16 sps:$4 sm:$0xff]   ;;  %v3137_v40 = vld [vmem:[#allocation7] ss:$16 sps:$4 sm:$0xff]  }
  0x4e   :  { %208 = vmatpush1.bf16.msra.mxu0 %v3077_v8  ;;  %658 = vmatprep.subr.bf16.mxu1 %v3108_v20  ;;  %v3138_v41 = vld [vmem:[#allocation7 + $0x1e4] ss:$16 sps:$4 sm:$0xff]   ;;  %v3110_v42 = vld [vmem:[#allocation7 + $0x88] ss:$16 sps:$4 sm:$0xff]   ;;  %v3118_v43 = vld [vmem:[#allocation7 + $0x6c] ss:$16 sps:$4 sm:$0xff]  }
  0x4f   :  { %209 = vmatprep.subr.bf16.mxu0 %v3078_v10  ;;  %v3143_v44 = vld [vmem:[#allocation7 + $0x1e0] ss:$16 sps:$4 sm:$0xff]   ;;  %v3144_v45 = vld [vmem:[#allocation7 + $0x1c4] ss:$16 sps:$4 sm:$0xff]   ;;  %v3116_v46 = vld [vmem:[#allocation7 + $0x68] ss:$16 sps:$4 sm:$0xff]  }
  0x50   :  { %v3149_v47 = vld [vmem:[#allocation7 + $0x1c0] ss:$16 sps:$4 sm:$0xff]   ;;  %v3124_v48 = vld [vmem:[#allocation7 + $0x4c] ss:$16 sps:$4 sm:$0xff]   ;;  %v3150_v49 = vld [vmem:[#allocation7 + $0x1a4] ss:$16 sps:$4 sm:$0xff]  }
  0x51   :  { %659 = vmatpush1.bf16.msra.mxu1 %v3113_v23  ;;  %v3122_v50 = vld [vmem:[#allocation7 + $0x48] ss:$16 sps:$4 sm:$0xff]   ;;  %v3155_v51 = vld [vmem:[#allocation7 + $0x1a0] ss:$16 sps:$4 sm:$0xff]   ;;  %v3130_v52 = vld [vmem:[#allocation7 + $0x2c] ss:$16 sps:$4 sm:$0xff]  }
  0x52   :  { %210 = vmatpush1.bf16.msra.mxu0 %v3080_v13  ;;  %660 = vmatprep.subr.bf16.mxu1 %v3114_v24  ;;  %v3156_v53 = vld [vmem:[#allocation7 + $0x184] ss:$16 sps:$4 sm:$0xff]   ;;  %v3128_v54 = vld [vmem:[#allocation7 + $0x28] ss:$16 sps:$4 sm:$0xff]   ;;  %v3161_v55 = vld [vmem:[#allocation7 + $0x180] ss:$16 sps:$4 sm:$0xff]  }
  0x53   :  { %211 = vmatprep.subr.bf16.mxu0 %v3081_v14  ;;  %v3136_v56 = vld [vmem:[#allocation7 + $0xc] ss:$16 sps:$4 sm:$0xff]   ;;  %v3162_v57 = vld [vmem:[#allocation7 + $0x164] ss:$16 sps:$4 sm:$0xff]   ;;  %v3134_v58 = vld [vmem:[#allocation7 + $0x8] ss:$16 sps:$4 sm:$0xff]  }
  0x54   :  { %v3167_v59 = vld [vmem:[#allocation7 + $0x160] ss:$16 sps:$4 sm:$0xff]   ;;  %v3142_v60 = vld [vmem:[#allocation7 + $0x1ec] ss:$16 sps:$4 sm:$0xff]   ;;  %v3168_v61 = vld [vmem:[#allocation7 + $0x144] ss:$16 sps:$4 sm:$0xff]  }
  0x55   :  { %661 = vmatpush1.bf16.msra.mxu1 %v3119_v27  ;;  %v3140_v62 = vld [vmem:[#allocation7 + $0x1e8] ss:$16 sps:$4 sm:$0xff]   ;;  %v3173_v63 = vld [vmem:[#allocation7 + $0x140] ss:$16 sps:$4 sm:$0xff]   ;;  %v3148_v0 = vld [vmem:[#allocation7 + $0x1cc] ss:$16 sps:$4 sm:$0xff]  }
  0x56   :  { %212 = vmatpush1.bf16.msra.mxu0 %v3083_v17  ;;  %662 = vmatprep.subr.bf16.mxu1 %v3120_v28  ;;  %v3146_v1 = vld [vmem:[#allocation7 + $0x1c8] ss:$16 sps:$4 sm:$0xff]   ;;  %v3154_v2 = vld [vmem:[#allocation7 + $0x1ac] ss:$16 sps:$4 sm:$0xff]   ;;  %v3174_v10 = vld [vmem:[#allocation7 + $0x124] ss:$16 sps:$4 sm:$0xff]  }
  0x57   :  { %213 = vmatprep.subr.bf16.mxu0 %v3084_v18  ;;  %v3152_v3 = vld [vmem:[#allocation7 + $0x1a8] ss:$16 sps:$4 sm:$0xff]   ;;  %v3160_v4 = vld [vmem:[#allocation7 + $0x18c] ss:$16 sps:$4 sm:$0xff]   ;;  %v3179_v13 = vld [vmem:[#allocation7 + $0x120] ss:$16 sps:$4 sm:$0xff]  }
  0x58   :  { %v3158_v5 = vld [vmem:[#allocation7 + $0x188] ss:$16 sps:$4 sm:$0xff]   ;;  %v3166_v6 = vld [vmem:[#allocation7 + $0x16c] ss:$16 sps:$4 sm:$0xff]   ;;  %v3180_v14 = vld [vmem:[#allocation7 + $0x104] ss:$16 sps:$4 sm:$0xff]  }
  0x59   :  { %663 = vmatpush1.bf16.msra.mxu1 %v3125_v32  ;;  %v3164_v7 = vld [vmem:[#allocation7 + $0x168] ss:$16 sps:$4 sm:$0xff]   ;;  %v3172_v8 = vld [vmem:[#allocation7 + $0x14c] ss:$16 sps:$4 sm:$0xff]   ;;  %v3185_v17 = vld [vmem:[#allocation7 + $0x100] ss:$16 sps:$4 sm:$0xff]  }
  0x5a   :  { %214 = vmatpush1.bf16.msra.mxu0 %v3086_v21  ;;  %664 = vmatprep.subr.bf16.mxu1 %v3126_v33  ;;  %v3170_v9 = vld [vmem:[#allocation7 + $0x148] ss:$16 sps:$4 sm:$0xff]   ;;  %v3178_v11 = vld [vmem:[#allocation7 + $0x12c] ss:$16 sps:$4 sm:$0xff]  }
  0x5b   :  { %215 = vmatprep.subr.bf16.mxu0 %v3087_v22  ;;  %v3176_v12 = vld [vmem:[#allocation7 + $0x128] ss:$16 sps:$4 sm:$0xff]   ;;  %v3184_v15 = vld [vmem:[#allocation7 + $0x10c] ss:$16 sps:$4 sm:$0xff]  }
  0x5c   :  { %v3182_v16 = vld [vmem:[#allocation7 + $0x108] ss:$16 sps:$4 sm:$0xff]  }
  0x5d   :  { %665 = vmatpush1.bf16.msra.mxu1 %v3131_v36  ;;  %v798_v18 = vld [vmem:[#allocation10 + $0x1c0] sm:$0xff] }
  0x5e   :  { %216 = vmatpush1.bf16.msra.mxu0 %v3089_v25  ;;  %666 = vmatprep.subr.bf16.mxu1 %v3132_v37  ;;  %v802_v19 = vld [vmem:[#allocation10 + $0x1e0] sm:$0xff] }
  0x5f   :  { %693 = vmatprep.subr.bf16.mxu0 %v3094_v26  ;;  %v926_v20 = vld [vmem:[#allocation10 + $0x5c0] sm:$0xff]  ;;  %v2845_v21 = vcombine.low %v798_v18, %v802_v19  ;;  %v2846_v22 = vcombine.high %v798_v18, %v802_v19  ;;  %v111_v26 = vlaneseq }
  0x60   :  { %v930_v23 = vld [vmem:[#allocation10 + $0x5e0] sm:$0xff] }
  0x61   :  { %234 = vmatmul.mubr.bf16.vlgmr.msra.gmra.mxu0 %v92_v29  ;;  %667 = vmatpush1.bf16.msra.mxu1 %v3137_v40  ;;  %v2973_v24 = vcombine.low %v926_v20, %v930_v23  ;;  %v2974_v25 = vcombine.high %v926_v20, %v930_v23  ;;  %v3382_v27 = vshrl.u32 %v111_v26, 7  ;;  %v109_v29 = vld [vmem:[%s3455_s2] sm:$0x3]  ;;  %v754_v18 = vld [vmem:[#allocation10 + $0x60] sm:$0xff] }
  0x62   :  { %694 = vmatpush1.bf16.msra.mxu0 %v3092_v30  ;;  %668 = vmatprep.subr.bf16.mxu1 %v3138_v41  ;;  %v794_v41 = vld [vmem:[#allocation10 + $0x1a0] sm:$0xff] }
  0x63   :  { %695 = vmatprep.subr.bf16.mxu0 %v3100_v31  ;;  %v3385_v28 = vsub.s32 0, %v3382_v27  ;;  %v3391_v30 = vsub.s32 1, %v3382_v27  ;;  %v878_v19 = vld [vmem:[#allocation10 + $0x440] sm:$0xff] }
  0x64   :  { %v882_v20 = vld [vmem:[#allocation10 + $0x460] sm:$0xff] }
  0x65   :  { %669 = vmatpush2.bf16.msra.mxu1 %v3143_v44  ;;  %v114_v31 = vrot.slane %v109_v29, %v3385_v28  ;;  %v118_v32 = vrot.slane %v109_v29, %v3391_v30  ;;  %v746_v26 = vld [vmem:[#allocation10 + $0x20] sm:$0xff] }
  0x66   :  { %696 = vmatpush1.bf16.msra.mxu0 %v3098_v34  ;;  %670 = vmatprep.subr.bf16.mxu1 %v3144_v45  ;;  %v870_v29 = vld [vmem:[#allocation10 + $0x400] sm:$0xff] }
  0x67   :  { %697 = vmatprep.subr.bf16.mxu0 %v3106_v35 }
  0x69   :  { %671 = vmatpush2.bf16.msra.mxu1 %v3149_v47 }
  0x6a   :  { %698 = vmatpush1.bf16.msra.mxu0 %v3104_v38  ;;  %672 = vmatprep.subr.bf16.mxu1 %v3150_v49  ;;  %v782_v49 = vld [vmem:[#allocation10 + $0x140] sm:$0xff] }
  0x6b   :  { %699 = vmatprep.subr.bf16.mxu0 %v3112_v39  ;;  %v790_v39 = vld [vmem:[#allocation10 + $0x180] sm:$0xff] }
  0x6c   :  { %v2838_v47 = vcombine.high %v790_v39, %v794_v41 }
  0x6d   :  { %673 = vmatpush2.bf16.msra.mxu1 %v3155_v51  ;;  %v910_v51 = vld [vmem:[#allocation10 + $0x540] sm:$0xff] }
  0x6e   :  { %700 = vmatpush1.bf16.msra.mxu0 %v3110_v42  ;;  %674 = vmatprep.subr.bf16.mxu1 %v3156_v53  ;;  %v918_v42 = vld [vmem:[#allocation10 + $0x580] sm:$0xff]  ;;  %v2837_v53 = vcombine.low %v790_v39, %v794_v41 }
  0x6f   :  { %701 = vmatprep.subr.bf16.mxu0 %v3118_v43  ;;  %v922_v43 = vld [vmem:[#allocation10 + $0x5a0] sm:$0xff] }
  0x70   :  { %v994_v39 = vld [vmem:[#allocation10 + $0x7e0] sm:$0xff] }
  0x71   :  { %675 = vmatpush2.bf16.msra.mxu1 %v3161_v55 }
  0x72   :  { %702 = vmatpush1.bf16.msra.mxu0 %v3116_v46  ;;  %676 = vmatprep.subr.bf16.mxu1 %v3162_v57  ;;  %v774_v57 = vld [vmem:[#allocation10 + $0x100] sm:$0xff] }
  0x73   :  { %703 = vmatprep.subr.bf16.mxu0 %v3124_v48  ;;  %v2966_v48 = vcombine.high %v918_v42, %v922_v43 }
  0x75   :  { %677 = vmatpush2.bf16.msra.mxu1 %v3167_v59  ;;  %v902_v59 = vld [vmem:[#allocation10 + $0x500] sm:$0xff] }
  0x76   :  { %704 = vmatpush1.bf16.msra.mxu0 %v3122_v50  ;;  %678 = vmatprep.subr.bf16.mxu1 %v3168_v61  ;;  %v786_v50 = vld [vmem:[#allocation10 + $0x160] sm:$0xff] }
  0x77   :  { %705 = vmatprep.subr.bf16.mxu0 %v3130_v52  ;;  %v914_v52 = vld [vmem:[#allocation10 + $0x560] sm:$0xff]  ;;  %v2830_v55 = vcombine.high %v782_v49, %v786_v50  ;;  %v2829_v61 = vcombine.low %v782_v49, %v786_v50 }
  0x79   :  { %679 = vmatpush2.bf16.msra.mxu1 %v3173_v63 }
  0x7a   :  { %706 = vmatpush1.bf16.msra.mxu0 %v3128_v54  ;;  %680 = vmatprep.subr.bf16.mxu1 %v3174_v10  ;;  %v2965_v54 = vcombine.low %v918_v42, %v922_v43  ;;  %v762_v10 = vld [vmem:[#allocation10 + $0xa0] sm:$0xff] }
  0x7b   :  { %707 = vmatprep.subr.bf16.mxu0 %v3136_v56  ;;  %v2958_v56 = vcombine.high %v910_v51, %v914_v52 }
  0x7d   :  { %681 = vmatpush2.bf16.msra.mxu1 %v3179_v13 }
  0x7e   :  { %708 = vmatpush1.bf16.msra.mxu0 %v3134_v58  ;;  %682 = vmatprep.subr.bf16.mxu1 %v3180_v14  ;;  %v778_v58 = vld [vmem:[#allocation10 + $0x120] sm:$0xff] }
  0x7f   :  { %709 = vmatprep.subr.bf16.mxu0 %v3142_v60  ;;  %v906_v60 = vld [vmem:[#allocation10 + $0x520] sm:$0xff]  ;;  %v2822_v63 = vcombine.high %v774_v57, %v778_v58 }
  0x81   :  { %683 = vmatpush2.bf16.msra.mxu1 %v3185_v17  ;;  %v750_v17 = vld [vmem:[#allocation10 + $0x40] sm:$0xff] }
  0x82   :  { %710 = vmatpush2.bf16.msra.mxu0 %v3140_v62  ;;  %2320 = vmatprep.subr.bf16.mxu1 %v2846_v22  ;;  %v2957_v62 = vcombine.low %v910_v51, %v914_v52  ;;  %v2798_v23 = vcombine.high %v750_v17, %v754_v18  ;;  %v846_v52 = vld [vmem:[#allocation10 + $0x340] sm:$0xff] }
  0x83   :  { %711 = vmatprep.subr.bf16.mxu0 %v3148_v0  ;;  %v2950_v0 = vcombine.high %v902_v59, %v906_v60 }
  0x86   :  { %712 = vmatpush2.bf16.msra.mxu0 %v3146_v1  ;;  %v766_v1 = vld [vmem:[#allocation10 + $0xc0] sm:$0xff] }
  0x87   :  { %713 = vmatprep.subr.bf16.mxu0 %v3154_v2  ;;  %v770_v2 = vld [vmem:[#allocation10 + $0xe0] sm:$0xff] }
  0x88   :  { %v2813_v13 = vcombine.low %v766_v1, %v770_v2 }
  0x8a   :  { %714 = vmatpush2.bf16.msra.mxu0 %v3152_v3  ;;  %v894_v3 = vld [vmem:[#allocation10 + $0x4c0] sm:$0xff] }
  0x8b   :  { %715 = vmatprep.subr.bf16.mxu0 %v3160_v4  ;;  %v898_v4 = vld [vmem:[#allocation10 + $0x4e0] sm:$0xff] }
  0x8c   :  { %v2941_v14 = vcombine.low %v894_v3, %v898_v4 }
  0x8e   :  { %716 = vmatpush2.bf16.msra.mxu0 %v3158_v5  ;;  %v2821_v5 = vcombine.low %v774_v57, %v778_v58 }
  0x8f   :  { %717 = vmatprep.subr.bf16.mxu0 %v3166_v6  ;;  %v2949_v6 = vcombine.low %v902_v59, %v906_v60  ;;  %v838_v60 = vld [vmem:[#allocation10 + $0x300] sm:$0xff] }
  0x92   :  { %718 = vmatpush2.bf16.msra.mxu0 %v3164_v7  ;;  %v2814_v7 = vcombine.high %v766_v1, %v770_v2 }
  0x93   :  { %719 = vmatprep.subr.bf16.mxu0 %v3172_v8  ;;  %v2942_v8 = vcombine.high %v894_v3, %v898_v4  ;;  %v830_v4 = vld [vmem:[#allocation10 + $0x2c0] sm:$0xff] }
  0x96   :  { %720 = vmatpush2.bf16.msra.mxu0 %v3170_v9  ;;  %v758_v9 = vld [vmem:[#allocation10 + $0x80] sm:$0xff] }
  0x97   :  { %721 = vmatprep.subr.bf16.mxu0 %v3178_v11  ;;  %v886_v11 = vld [vmem:[#allocation10 + $0x480] sm:$0xff] }
  0x9a   :  { %722 = vmatpush2.bf16.msra.mxu0 %v3176_v12  ;;  %v890_v12 = vld [vmem:[#allocation10 + $0x4a0] sm:$0xff] }
  0x9b   :  { %723 = vmatprep.subr.bf16.mxu0 %v3184_v15  ;;  %v2806_v15 = vcombine.high %v758_v9, %v762_v10  ;;  %v2933_v22 = vcombine.low %v886_v11, %v890_v12 }
  0x9e   :  { %724 = vmatpush2.bf16.msra.mxu0 %v3182_v16  ;;  %v2934_v16 = vcombine.high %v886_v11, %v890_v12  ;;  %v822_v12 = vld [vmem:[#allocation10 + $0x280] sm:$0xff] }
  0x9f   :  { %2361 = vmatprep.subr.bf16.mxu0 %v2974_v25  ;;  %v742_v25 = vld [vmem:[#allocation10] sm:$0xff] }
 0x121   :  { %v235_v33 = vpop.f32.mrf.mxu0 }
 0x122   :  { %v236_v34 = vadd.f32 %v235_v33, %v114_v31  ;;  %v874_v31 = vld [vmem:[#allocation10 + $0x420] sm:$0xff]  ;;  %v2925_v33 = vcombine.low %v878_v19, %v882_v20 }
 0x123   :  { %v237_v35 = vpop.f32.mrf.mxu0  ;;  %v2917_v41 = vcombine.low %v870_v29, %v874_v31 }
 0x124   :  { %v238_v36 = vadd.f32 %v237_v35, %v118_v32  ;;  %v242_v37 = vmax.f32 %v236_v34, 0.0  ;;  %v2797_v32 = vcombine.low %v750_v17, %v754_v18  ;;  %v2790_v34 = vcombine.high %v742_v25, %v746_v26 }
 0x125   :  { %v239_v38 = vpop.f32.mrf.mxu0  ;;  %v2918_v35 = vcombine.high %v870_v29, %v874_v31 }
 0x126   :  { %v243_v40 = vmax.f32 %v238_v36, 0.0  ;;  %v244_v46 = vpack.c.bf16 %v242_v37, %v242_v37  ;;  %v862_v36 = vld [vmem:[#allocation10 + $0x3c0] sm:$0xff] }
 0x127   :  { %v240_v44 = vpop.f32.mrf.mxu0  ;;  %v866_v37 = vld [vmem:[#allocation10 + $0x3e0] sm:$0xff] }
 0x128   :  { %v245_v45 = vpack.c.bf16 %v243_v40, %v243_v40  ;;  %v990_v38 = vld [vmem:[#allocation10 + $0x7c0] sm:$0xff]  ;;  %v2789_v40 = vcombine.low %v742_v25, %v746_v26  ;;  %v2910_v42 = vcombine.high %v862_v36, %v866_v37 }
 0x129   :  { %v3038_v43 = vcombine.high %v990_v38, %v994_v39  ;;  %v854_v44 = vld [vmem:[#allocation10 + $0x380] sm:$0xff]  ;;  %v3037_v49 = vcombine.low %v990_v38, %v994_v39 }
 0x12a   :  { %684 = vmatprep.mubr.bf16.mxu1 %v245_v45  ;;  %725 = vmatprep.mubr.bf16.mxu0 %v245_v45  ;;  %v858_v45 = vld [vmem:[#allocation10 + $0x3a0] sm:$0xff] }
 0x12b   :  { %685 = vmatmul.mubr.bf16.vlgmr.msra.gmra.mxu1 %v244_v46  ;;  %726 = vmatmul.mubr.bf16.vlgmr.msra.gmra.mxu0 %v244_v46  ;;  %v982_v46 = vld [vmem:[#allocation10 + $0x780] sm:$0xff]  ;;  %v2902_v50 = vcombine.high %v854_v44, %v858_v45 }
 0x12c   :  { %2321 = vmatpush1.bf16.msra.mxu1 %v2845_v21  ;;  %2362 = vmatpush1.bf16.msra.mxu0 %v2973_v24  ;;  %v2805_v21 = vcombine.low %v758_v9, %v762_v10  ;;  %v2926_v24 = vcombine.high %v878_v19, %v882_v20  ;;  %v946_v26 = vld [vmem:[#allocation10 + $0x660] sm:$0xff] }
 0x12d   :  { %2322 = vmatprep.subr.bf16.mxu1 %v2838_v47  ;;  %2363 = vmatprep.subr.bf16.mxu0 %v2966_v48  ;;  %v986_v47 = vld [vmem:[#allocation10 + $0x7a0] sm:$0xff]  ;;  %v2909_v48 = vcombine.low %v862_v36, %v866_v37 }
 0x12e   :  { %v3030_v51 = vcombine.high %v982_v46, %v986_v47  ;;  %v3029_v57 = vcombine.low %v982_v46, %v986_v47  ;;  %v938_v37 = vld [vmem:[#allocation10 + $0x620] sm:$0xff] }
 0x130   :  { %2323 = vmatpush1.bf16.msra.mxu1 %v2837_v53  ;;  %2364 = vmatpush1.bf16.msra.mxu0 %v2965_v54  ;;  %v850_v53 = vld [vmem:[#allocation10 + $0x360] sm:$0xff] }
 0x131   :  { %2324 = vmatprep.subr.bf16.mxu1 %v2830_v55  ;;  %2365 = vmatprep.subr.bf16.mxu0 %v2958_v56  ;;  %v974_v54 = vld [vmem:[#allocation10 + $0x740] sm:$0xff]  ;;  %v2901_v56 = vcombine.low %v854_v44, %v858_v45  ;;  %v2894_v58 = vcombine.high %v846_v52, %v850_v53  ;;  %v931_v45 = vld [vmem:[#allocation10 + $0x5e8] sm:$0xff] }
 0x132   :  { %v978_v55 = vld [vmem:[#allocation10 + $0x760] sm:$0xff] }
 0x133   :  { %v3022_v59 = vcombine.high %v974_v54, %v978_v55  ;;  %v3021_v1 = vcombine.low %v974_v54, %v978_v55 }
 0x134   :  { %2325 = vmatpush1.bf16.msra.mxu1 %v2829_v61  ;;  %2366 = vmatpush1.bf16.msra.mxu0 %v2957_v62  ;;  %v842_v61 = vld [vmem:[#allocation10 + $0x320] sm:$0xff] }
 0x135   :  { %2326 = vmatprep.subr.bf16.mxu1 %v2822_v63  ;;  %2367 = vmatprep.subr.bf16.mxu0 %v2950_v0  ;;  %v966_v62 = vld [vmem:[#allocation10 + $0x700] sm:$0xff]  ;;  %v2893_v0 = vcombine.low %v846_v52, %v850_v53  ;;  %v2886_v2 = vcombine.high %v838_v60, %v842_v61 }
 0x136   :  { %v970_v63 = vld [vmem:[#allocation10 + $0x720] sm:$0xff] }
 0x137   :  { %v3014_v3 = vcombine.high %v966_v62, %v970_v63  ;;  %v3013_v9 = vcombine.low %v966_v62, %v970_v63 }
 0x138   :  { %2327 = vmatpush1.bf16.msra.mxu1 %v2821_v5  ;;  %2368 = vmatpush1.bf16.msra.mxu0 %v2949_v6  ;;  %v834_v5 = vld [vmem:[#allocation10 + $0x2e0] sm:$0xff] }
 0x139   :  { %2328 = vmatprep.subr.bf16.mxu1 %v2814_v7  ;;  %2369 = vmatprep.subr.bf16.mxu0 %v2942_v8  ;;  %v958_v6 = vld [vmem:[#allocation10 + $0x6c0] sm:$0xff]  ;;  %v2885_v8 = vcombine.low %v838_v60, %v842_v61  ;;  %v2878_v10 = vcombine.high %v830_v4, %v834_v5 }
 0x13a   :  { %v962_v7 = vld [vmem:[#allocation10 + $0x6e0] sm:$0xff] }
 0x13b   :  { %v3006_v11 = vcombine.high %v958_v6, %v962_v7  ;;  %v3005_v17 = vcombine.low %v958_v6, %v962_v7  ;;  %v791_v6 = vld [vmem:[#allocation10 + $0x188] sm:$0xff] }
 0x13c   :  { %2329 = vmatpush1.bf16.msra.mxu1 %v2813_v13  ;;  %2370 = vmatpush1.bf16.msra.mxu0 %v2941_v14  ;;  %v826_v13 = vld [vmem:[#allocation10 + $0x2a0] sm:$0xff] }
 0x13d   :  { %2330 = vmatprep.subr.bf16.mxu1 %v2806_v15  ;;  %2371 = vmatprep.subr.bf16.mxu0 %v2934_v16  ;;  %v950_v14 = vld [vmem:[#allocation10 + $0x680] sm:$0xff]  ;;  %v2877_v16 = vcombine.low %v830_v4, %v834_v5  ;;  %v2870_v18 = vcombine.high %v822_v12, %v826_v13  ;;  %v2869_v20 = vcombine.low %v822_v12, %v826_v13 }
 0x13e   :  { %v954_v15 = vld [vmem:[#allocation10 + $0x6a0] sm:$0xff] }
 0x13f   :  { %v2998_v19 = vcombine.high %v950_v14, %v954_v15 }
 0x140   :  { %2331 = vmatpush1.bf16.msra.mxu1 %v2805_v21  ;;  %2372 = vmatpush1.bf16.msra.mxu0 %v2933_v22  ;;  %v2997_v21 = vcombine.low %v950_v14, %v954_v15  ;;  %v814_v22 = vld [vmem:[#allocation10 + $0x240] sm:$0xff] }
 0x141   :  { %2332 = vmatprep.subr.bf16.mxu1 %v2798_v23  ;;  %2373 = vmatprep.subr.bf16.mxu0 %v2926_v24  ;;  %v818_v23 = vld [vmem:[#allocation10 + $0x260] sm:$0xff] }
 0x142   :  { %v942_v24 = vld [vmem:[#allocation10 + $0x640] sm:$0xff]  ;;  %v2862_v25 = vcombine.high %v814_v22, %v818_v23  ;;  %v2861_v29 = vcombine.low %v814_v22, %v818_v23 }
 0x143   :  { %v2989_v31 = vcombine.low %v942_v24, %v946_v26 }
 0x144   :  { %2333 = vmatpush1.bf16.msra.mxu1 %v2797_v32  ;;  %2374 = vmatpush1.bf16.msra.mxu0 %v2925_v33  ;;  %v2990_v32 = vcombine.high %v942_v24, %v946_v26  ;;  %v806_v33 = vld [vmem:[#allocation10 + $0x200] sm:$0xff]  ;;  %v775_v26 = vld [vmem:[#allocation10 + $0x108] sm:$0xff] }
 0x145   :  { %2334 = vmatprep.subr.bf16.mxu1 %v2790_v34  ;;  %2375 = vmatprep.subr.bf16.mxu0 %v2918_v35  ;;  %v810_v34 = vld [vmem:[#allocation10 + $0x220] sm:$0xff] }
 0x146   :  { %v934_v35 = vld [vmem:[#allocation10 + $0x600] sm:$0xff]  ;;  %v2854_v36 = vcombine.high %v806_v33, %v810_v34  ;;  %v2853_v38 = vcombine.low %v806_v33, %v810_v34 }
 0x147   :  { %v2981_v39 = vcombine.low %v934_v35, %v938_v37 }
 0x148   :  { %2335 = vmatpush1.bf16.msra.mxu1 %v2789_v40  ;;  %2376 = vmatpush1.bf16.msra.mxu0 %v2917_v41  ;;  %v2982_v40 = vcombine.high %v934_v35, %v938_v37  ;;  %v799_v41 = vld [vmem:[#allocation10 + $0x1c8] sm:$0xff] }
 0x149   :  { %2336 = vmatprep.subr.bf16.mxu1 %v2910_v42  ;;  %2377 = vmatprep.subr.bf16.mxu0 %v3038_v43  ;;  %v803_v42 = vld [vmem:[#allocation10 + $0x1e8] sm:$0xff] }
 0x14a   :  { %v927_v43 = vld [vmem:[#allocation10 + $0x5c8] sm:$0xff]  ;;  %v2848_v44 = vcombine.high %v799_v41, %v803_v42  ;;  %v2847_v46 = vcombine.low %v799_v41, %v803_v42 }
 0x14b   :  { %v2975_v47 = vcombine.low %v927_v43, %v931_v45  ;;  %v767_v37 = vld [vmem:[#allocation10 + $0xc8] sm:$0xff] }
 0x14c   :  { %2337 = vmatpush2.bf16.msra.mxu1 %v2909_v48  ;;  %2378 = vmatpush2.bf16.msra.mxu0 %v3037_v49  ;;  %v2976_v48 = vcombine.high %v927_v43, %v931_v45  ;;  %v322_v49 = vsub.s32 2, %v3382_v27  ;;  %v759_v45 = vld [vmem:[#allocation10 + $0x88] sm:$0xff] }
 0x14d   :  { %2338 = vmatprep.subr.bf16.mxu1 %v2902_v50  ;;  %2379 = vmatprep.subr.bf16.mxu0 %v3030_v51  ;;  %v310_v50 = vld [vmem:[#allocation8] sm:$0xf]  ;;  %v326_v51 = vsub.s32 3, %v3382_v27 }
 0x14e   :  { %v315_v52 = vrot.slane %v310_v50, %v3385_v28  ;;  %v323_v53 = vrot.slane %v310_v50, %v322_v49  ;;  %v319_v54 = vrot.slane %v310_v50, %v3391_v30 }
 0x14f   :  { %v327_v55 = vrot.slane %v310_v50, %v326_v51 }
 0x150   :  { %2339 = vmatpush2.bf16.msra.mxu1 %v2901_v56  ;;  %2380 = vmatpush2.bf16.msra.mxu0 %v3029_v57 }
 0x151   :  { %2340 = vmatprep.subr.bf16.mxu1 %v2894_v58  ;;  %2381 = vmatprep.subr.bf16.mxu0 %v3022_v59 }
 0x154   :  { %2341 = vmatpush2.bf16.msra.mxu1 %v2893_v0  ;;  %2382 = vmatpush2.bf16.msra.mxu0 %v3021_v1 }
 0x155   :  { %2342 = vmatprep.subr.bf16.mxu1 %v2886_v2  ;;  %2383 = vmatprep.subr.bf16.mxu0 %v3014_v3 }
 0x158   :  { %2343 = vmatpush2.bf16.msra.mxu1 %v2885_v8  ;;  %2384 = vmatpush2.bf16.msra.mxu0 %v3013_v9  ;;  %v795_v9 = vld [vmem:[#allocation10 + $0x1a8] sm:$0xff] }
 0x159   :  { %2344 = vmatprep.subr.bf16.mxu1 %v2878_v10  ;;  %2385 = vmatprep.subr.bf16.mxu0 %v3006_v11  ;;  %v919_v10 = vld [vmem:[#allocation10 + $0x588] sm:$0xff]  ;;  %v2839_v22 = vcombine.low %v791_v6, %v795_v9 }
 0x15a   :  { %v923_v11 = vld [vmem:[#allocation10 + $0x5a8] sm:$0xff] }
 0x15b   :  { %v2967_v23 = vcombine.low %v919_v10, %v923_v11 }
 0x15c   :  { %2345 = vmatpush2.bf16.msra.mxu1 %v2877_v16  ;;  %2386 = vmatpush2.bf16.msra.mxu0 %v3005_v17  ;;  %v783_v16 = vld [vmem:[#allocation10 + $0x148] sm:$0xff]  ;;  %v2840_v17 = vcombine.high %v791_v6, %v795_v9 }
 0x15d   :  { %2346 = vmatprep.subr.bf16.mxu1 %v2870_v18  ;;  %2387 = vmatprep.subr.bf16.mxu0 %v2998_v19  ;;  %v2968_v18 = vcombine.high %v919_v10, %v923_v11  ;;  %v787_v19 = vld [vmem:[#allocation10 + $0x168] sm:$0xff] }
 0x15e   :  { %v2832_v24 = vcombine.high %v783_v16, %v787_v19  ;;  %v2831_v33 = vcombine.low %v783_v16, %v787_v19  ;;  %v991_v9 = vld [vmem:[#allocation10 + $0x7c8] sm:$0xff] }
 0x15f   :  { %v995_v10 = vld [vmem:[#allocation10 + $0x7e8] sm:$0xff] }
 0x160   :  { %2347 = vmatpush2.bf16.msra.mxu1 %v2869_v20  ;;  %2388 = vmatpush2.bf16.msra.mxu0 %v2997_v21  ;;  %v911_v20 = vld [vmem:[#allocation10 + $0x548] sm:$0xff] }
 0x161   :  { %2348 = vmatprep.subr.bf16.mxu1 %v2862_v25  ;;  %2389 = vmatprep.subr.bf16.mxu0 %v2990_v32  ;;  %v915_v21 = vld [vmem:[#allocation10 + $0x568] sm:$0xff] }
 0x162   :  { %v2960_v25 = vcombine.high %v911_v20, %v915_v21  ;;  %v907_v32 = vld [vmem:[#allocation10 + $0x528] sm:$0xff]  ;;  %v2959_v34 = vcombine.low %v911_v20, %v915_v21 }
 0x163   :  { %v855_v19 = vld [vmem:[#allocation10 + $0x388] sm:$0xff] }
 0x164   :  { %2349 = vmatpush2.bf16.msra.mxu1 %v2861_v29  ;;  %2390 = vmatpush2.bf16.msra.mxu0 %v2989_v31  ;;  %v779_v29 = vld [vmem:[#allocation10 + $0x128] sm:$0xff] }
 0x165   :  { %2350 = vmatprep.subr.bf16.mxu1 %v2854_v36  ;;  %2391 = vmatprep.subr.bf16.mxu0 %v2982_v40  ;;  %v903_v31 = vld [vmem:[#allocation10 + $0x508] sm:$0xff]  ;;  %v2824_v35 = vcombine.high %v775_v26, %v779_v29  ;;  %v2823_v41 = vcombine.low %v775_v26, %v779_v29 }
 0x166   :  { %v2952_v36 = vcombine.high %v903_v31, %v907_v32  ;;  %v899_v40 = vld [vmem:[#allocation10 + $0x4e8] sm:$0xff]  ;;  %v2951_v42 = vcombine.low %v903_v31, %v907_v32 }
 0x167   :  { %v859_v20 = vld [vmem:[#allocation10 + $0x3a8] sm:$0xff] }
 0x168   :  { %2351 = vmatpush2.bf16.msra.mxu1 %v2853_v38  ;;  %2392 = vmatpush2.bf16.msra.mxu0 %v2981_v39  ;;  %v771_v38 = vld [vmem:[#allocation10 + $0xe8] sm:$0xff] }
 0x169   :  { %2402 = vmatprep.subr.bf16.mxu1 %v2848_v44  ;;  %2443 = vmatprep.subr.bf16.mxu0 %v2976_v48  ;;  %v895_v39 = vld [vmem:[#allocation10 + $0x4c8] sm:$0xff]  ;;  %v2816_v43 = vcombine.high %v767_v37, %v771_v38  ;;  %v2815_v50 = vcombine.low %v767_v37, %v771_v38 }
 0x16a   :  { %v2944_v44 = vcombine.high %v895_v39, %v899_v40  ;;  %v891_v48 = vld [vmem:[#allocation10 + $0x4a8] sm:$0xff] }
 0x16b   :  { %v983_v21 = vld [vmem:[#allocation10 + $0x788] sm:$0xff] }
 0x16c   :  { %v847_v29 = vld [vmem:[#allocation10 + $0x348] sm:$0xff] }
 0x16d   :  { %v851_v31 = vld [vmem:[#allocation10 + $0x368] sm:$0xff] }
 0x16e   :  { %v975_v32 = vld [vmem:[#allocation10 + $0x748] sm:$0xff] }
 0x16f   :  { %v839_v38 = vld [vmem:[#allocation10 + $0x308] sm:$0xff] }
 0x1eb   :  { %v686_v56 = vpop.f32.mrf.mxu1  ;;  %v727_v57 = vpop.f32.mrf.mxu0 }
 0x1ec   :  { %v687_v58 = vadd.f32 %v686_v56, %v315_v52  ;;  %v728_v59 = vadd.f32 %v727_v57, %v323_v53  ;;  %v2943_v52 = vcombine.low %v895_v39, %v899_v40  ;;  %v755_v56 = vld [vmem:[#allocation10 + $0x68] sm:$0xff] }
 0x1ed   :  { %v688_v60 = vpop.f32.mrf.mxu1  ;;  %v729_v61 = vpop.f32.mrf.mxu0  ;;  %v879_v57 = vld [vmem:[#allocation10 + $0x448] sm:$0xff] }
 0x1ee   :  { %v689_v62 = vadd.f32 %v688_v60, %v319_v54  ;;  %v730_v63 = vadd.f32 %v729_v61, %v327_v55  ;;  %v734_v0 = vmax.f32 %v687_v58, 0.0  ;;  %v736_v1 = vmax.f32 %v728_v59, 0.0  ;;  %v751_v55 = vld [vmem:[#allocation10 + $0x48] sm:$0xff] }
 0x1ef   :  { %v690_v2 = vpop.f32.mrf.mxu1  ;;  %v731_v3 = vpop.f32.mrf.mxu0  ;;  %v883_v58 = vld [vmem:[#allocation10 + $0x468] sm:$0xff]  ;;  %v2800_v61 = vcombine.high %v751_v55, %v755_v56 }
 0x1f0   :  { %v735_v4 = vmax.f32 %v689_v62, 0.0  ;;  %v737_v5 = vmax.f32 %v730_v63, 0.0  ;;  %v3407_v14 = vpack.c.bf16 %v734_v0, %v734_v0  ;;  %v3409_v15 = vpack.c.bf16 %v736_v1, %v736_v1  ;;  %v743_v63 = vld [vmem:[#allocation10 + $0x8] sm:$0xff] }
 0x1f1   :  { %v691_v7 = vpop.f32.mrf.mxu1  ;;  %v732_v8 = vpop.f32.mrf.mxu0  ;;  %v2928_v62 = vcombine.high %v879_v57, %v883_v58  ;;  %v747_v0 = vld [vmem:[#allocation10 + $0x28] sm:$0xff]  ;;  %v2799_v3 = vcombine.low %v751_v55, %v755_v56 }
 0x1f2   :  { %v3403_v12 = vpack.c.bf16 %v735_v4, %v735_v4  ;;  %v3405_v13 = vpack.c.bf16 %v737_v5, %v737_v5  ;;  %v871_v1 = vld [vmem:[#allocation10 + $0x408] sm:$0xff]  ;;  %v2927_v4 = vcombine.low %v879_v57, %v883_v58  ;;  %v2792_v5 = vcombine.high %v743_v63, %v747_v0 }
 0x1f3   :  { %v875_v2 = vld [vmem:[#allocation10 + $0x428] sm:$0xff]  ;;  %v2791_v11 = vcombine.low %v743_v63, %v747_v0 }
 0x1f4   :  { %2352 = vmatprep.mubr.bf16.mxu1 %v3403_v12  ;;  %2393 = vmatprep.mubr.bf16.mxu0 %v3405_v13  ;;  %v2920_v6 = vcombine.high %v871_v1, %v875_v2  ;;  %v863_v7 = vld [vmem:[#allocation10 + $0x3c8] sm:$0xff]  ;;  %v2919_v16 = vcombine.low %v871_v1, %v875_v2 }
 0x1f5   :  { %2353 = vmatmul.mubr.bf16.vlgmr.msra.gmra.mxu1 %v3407_v14  ;;  %2394 = vmatmul.mubr.bf16.vlgmr.msra.gmra.mxu0 %v3409_v15  ;;  %v867_v8 = vld [vmem:[#allocation10 + $0x3e8] sm:$0xff] }
 0x1f6   :  { %2403 = vmatpush1.bf16.msra.mxu1 %v2847_v46  ;;  %2444 = vmatpush1.bf16.msra.mxu0 %v2975_v47  ;;  %v763_v46 = vld [vmem:[#allocation10 + $0xa8] sm:$0xff] }
 0x1f7   :  { %2434 = vmatprep.mubr.bf16.mxu1 %v3403_v12  ;;  %2475 = vmatprep.mubr.bf16.mxu0 %v3405_v13  ;;  %v887_v47 = vld [vmem:[#allocation10 + $0x488] sm:$0xff]  ;;  %v2808_v53 = vcombine.high %v759_v45, %v763_v46  ;;  %v2807_v59 = vcombine.low %v759_v45, %v763_v46 }
 0x1f8   :  { %2404 = vmatprep.subr.bf16.mxu1 %v2840_v17  ;;  %2445 = vmatprep.subr.bf16.mxu0 %v2968_v18  ;;  %v2936_v54 = vcombine.high %v887_v47, %v891_v48  ;;  %v2935_v60 = vcombine.low %v887_v47, %v891_v48  ;;  %v2912_v17 = vcombine.high %v863_v7, %v867_v8  ;;  %v843_v39 = vld [vmem:[#allocation10 + $0x328] sm:$0xff] }
 0x1f9   :  { %v3040_v18 = vcombine.high %v991_v9, %v995_v10  ;;  %v967_v40 = vld [vmem:[#allocation10 + $0x708] sm:$0xff] }
 0x1fa   :  { %2405 = vmatpush1.bf16.msra.mxu1 %v2839_v22  ;;  %2446 = vmatpush1.bf16.msra.mxu0 %v2967_v23  ;;  %v987_v22 = vld [vmem:[#allocation10 + $0x7a8] sm:$0xff]  ;;  %v2911_v23 = vcombine.low %v863_v7, %v867_v8 }
 0x1fb   :  { %2406 = vmatprep.subr.bf16.mxu1 %v2832_v24  ;;  %2447 = vmatprep.subr.bf16.mxu0 %v2960_v25  ;;  %v3039_v24 = vcombine.low %v991_v9, %v995_v10  ;;  %v2904_v25 = vcombine.high %v855_v19, %v859_v20  ;;  %v3032_v26 = vcombine.high %v983_v21, %v987_v22  ;;  %v831_v46 = vld [vmem:[#allocation10 + $0x2c8] sm:$0xff] }
 0x1fc   :  { %v835_v47 = vld [vmem:[#allocation10 + $0x2e8] sm:$0xff] }
 0x1fd   :  { %v959_v48 = vld [vmem:[#allocation10 + $0x6c8] sm:$0xff] }
 0x1fe   :  { %2407 = vmatpush1.bf16.msra.mxu1 %v2831_v33  ;;  %2448 = vmatpush1.bf16.msra.mxu0 %v2959_v34  ;;  %v979_v33 = vld [vmem:[#allocation10 + $0x768] sm:$0xff]  ;;  %v2903_v34 = vcombine.low %v855_v19, %v859_v20  ;;  %v800_v20 = vld [vmem:[#allocation10 + $0x1d0] sm:$0xff] }
 0x1ff   :  { %2408 = vmatprep.subr.bf16.mxu1 %v2824_v35  ;;  %2449 = vmatprep.subr.bf16.mxu0 %v2952_v36  ;;  %v3031_v35 = vcombine.low %v983_v21, %v987_v22  ;;  %v2896_v36 = vcombine.high %v847_v29, %v851_v31  ;;  %v3024_v37 = vcombine.high %v975_v32, %v979_v33  ;;  %v823_v56 = vld [vmem:[#allocation10 + $0x288] sm:$0xff]  ;;  %v804_v21 = vld [vmem:[#allocation10 + $0x1f0] sm:$0xff] }
 0x200   :  { %v827_v57 = vld [vmem:[#allocation10 + $0x2a8] sm:$0xff]  ;;  %v928_v22 = vld [vmem:[#allocation10 + $0x5d0] sm:$0xff] }
 0x201   :  { %v951_v58 = vld [vmem:[#allocation10 + $0x688] sm:$0xff] }
 0x202   :  { %2409 = vmatpush1.bf16.msra.mxu1 %v2823_v41  ;;  %2450 = vmatpush1.bf16.msra.mxu0 %v2951_v42  ;;  %v971_v41 = vld [vmem:[#allocation10 + $0x728] sm:$0xff]  ;;  %v2895_v42 = vcombine.low %v847_v29, %v851_v31  ;;  %v792_v31 = vld [vmem:[#allocation10 + $0x190] sm:$0xff] }
 0x203   :  { %2410 = vmatprep.subr.bf16.mxu1 %v2816_v43  ;;  %2451 = vmatprep.subr.bf16.mxu0 %v2944_v44  ;;  %v3023_v43 = vcombine.low %v975_v32, %v979_v33  ;;  %v2888_v44 = vcombine.high %v839_v38, %v843_v39  ;;  %v3016_v45 = vcombine.high %v967_v40, %v971_v41  ;;  %v815_v0 = vld [vmem:[#allocation10 + $0x248] sm:$0xff]  ;;  %v796_v32 = vld [vmem:[#allocation10 + $0x1b0] sm:$0xff] }
 0x204   :  { %v819_v1 = vld [vmem:[#allocation10 + $0x268] sm:$0xff]  ;;  %v920_v33 = vld [vmem:[#allocation10 + $0x590] sm:$0xff] }
 0x205   :  { %v943_v2 = vld [vmem:[#allocation10 + $0x648] sm:$0xff] }
 0x206   :  { %2411 = vmatpush1.bf16.msra.mxu1 %v2815_v50  ;;  %2452 = vmatpush1.bf16.msra.mxu0 %v2943_v52  ;;  %v963_v50 = vld [vmem:[#allocation10 + $0x6e8] sm:$0xff]  ;;  %v2887_v52 = vcombine.low %v839_v38, %v843_v39  ;;  %v784_v39 = vld [vmem:[#allocation10 + $0x150] sm:$0xff] }
 0x207   :  { %2412 = vmatprep.subr.bf16.mxu1 %v2808_v53  ;;  %2453 = vmatprep.subr.bf16.mxu0 %v2936_v54  ;;  %v3015_v53 = vcombine.low %v967_v40, %v971_v41  ;;  %v2880_v54 = vcombine.high %v831_v46, %v835_v47  ;;  %v3008_v55 = vcombine.high %v959_v48, %v963_v50  ;;  %v807_v8 = vld [vmem:[#allocation10 + $0x208] sm:$0xff]  ;;  %v788_v40 = vld [vmem:[#allocation10 + $0x170] sm:$0xff] }
 0x208   :  { %v811_v9 = vld [vmem:[#allocation10 + $0x228] sm:$0xff]  ;;  %v912_v41 = vld [vmem:[#allocation10 + $0x550] sm:$0xff] }
 0x209   :  { %v935_v10 = vld [vmem:[#allocation10 + $0x608] sm:$0xff] }
 0x20a   :  { %2413 = vmatpush1.bf16.msra.mxu1 %v2807_v59  ;;  %2454 = vmatpush1.bf16.msra.mxu0 %v2935_v60  ;;  %v955_v59 = vld [vmem:[#allocation10 + $0x6a8] sm:$0xff]  ;;  %v2879_v60 = vcombine.low %v831_v46, %v835_v47  ;;  %v776_v47 = vld [vmem:[#allocation10 + $0x110] sm:$0xff] }
 0x20b   :  { %2414 = vmatprep.subr.bf16.mxu1 %v2800_v61  ;;  %2455 = vmatprep.subr.bf16.mxu0 %v2928_v62  ;;  %v3007_v61 = vcombine.low %v959_v48, %v963_v50  ;;  %v2872_v62 = vcombine.high %v823_v56, %v827_v57  ;;  %v3000_v63 = vcombine.high %v951_v58, %v955_v59  ;;  %v780_v48 = vld [vmem:[#allocation10 + $0x130] sm:$0xff] }
 0x20c   :  { %v904_v50 = vld [vmem:[#allocation10 + $0x510] sm:$0xff] }
 0x20e   :  { %2415 = vmatpush1.bf16.msra.mxu1 %v2799_v3  ;;  %2456 = vmatpush1.bf16.msra.mxu0 %v2927_v4  ;;  %v947_v3 = vld [vmem:[#allocation10 + $0x668] sm:$0xff]  ;;  %v2871_v4 = vcombine.low %v823_v56, %v827_v57  ;;  %v768_v57 = vld [vmem:[#allocation10 + $0xd0] sm:$0xff] }
 0x20f   :  { %2416 = vmatprep.subr.bf16.mxu1 %v2792_v5  ;;  %2457 = vmatprep.subr.bf16.mxu0 %v2920_v6  ;;  %v2999_v5 = vcombine.low %v951_v58, %v955_v59  ;;  %v2864_v6 = vcombine.high %v815_v0, %v819_v1  ;;  %v2992_v7 = vcombine.high %v943_v2, %v947_v3  ;;  %v772_v58 = vld [vmem:[#allocation10 + $0xf0] sm:$0xff] }
 0x210   :  { %v896_v59 = vld [vmem:[#allocation10 + $0x4d0] sm:$0xff] }
 0x212   :  { %2417 = vmatpush1.bf16.msra.mxu1 %v2791_v11  ;;  %2458 = vmatpush1.bf16.msra.mxu0 %v2919_v16  ;;  %v939_v11 = vld [vmem:[#allocation10 + $0x628] sm:$0xff]  ;;  %v2863_v16 = vcombine.low %v815_v0, %v819_v1  ;;  %v760_v1 = vld [vmem:[#allocation10 + $0x90] sm:$0xff] }
 0x213   :  { %2418 = vmatprep.subr.bf16.mxu1 %v2912_v17  ;;  %2459 = vmatprep.subr.bf16.mxu0 %v3040_v18  ;;  %v2991_v17 = vcombine.low %v943_v2, %v947_v3  ;;  %v2856_v18 = vcombine.high %v807_v8, %v811_v9  ;;  %v2984_v19 = vcombine.high %v935_v10, %v939_v11  ;;  %v764_v2 = vld [vmem:[#allocation10 + $0xb0] sm:$0xff] }
 0x214   :  { %v888_v3 = vld [vmem:[#allocation10 + $0x490] sm:$0xff] }
 0x216   :  { %2419 = vmatpush2.bf16.msra.mxu1 %v2911_v23  ;;  %2460 = vmatpush2.bf16.msra.mxu0 %v3039_v24  ;;  %v932_v23 = vld [vmem:[#allocation10 + $0x5f0] sm:$0xff]  ;;  %v2855_v24 = vcombine.low %v807_v8, %v811_v9 }
 0x217   :  { %2420 = vmatprep.subr.bf16.mxu1 %v2904_v25  ;;  %2461 = vmatprep.subr.bf16.mxu0 %v3032_v26  ;;  %v2983_v25 = vcombine.low %v935_v10, %v939_v11  ;;  %v2850_v26 = vcombine.high %v800_v20, %v804_v21  ;;  %v2978_v29 = vcombine.high %v928_v22, %v932_v23  ;;  %v752_v9 = vld [vmem:[#allocation10 + $0x50] sm:$0xff] }
 0x218   :  { %v756_v10 = vld [vmem:[#allocation10 + $0x70] sm:$0xff] }
 0x219   :  { %v880_v11 = vld [vmem:[#allocation10 + $0x450] sm:$0xff] }
 0x21a   :  { %2421 = vmatpush2.bf16.msra.mxu1 %v2903_v34  ;;  %2462 = vmatpush2.bf16.msra.mxu0 %v3031_v35  ;;  %v924_v34 = vld [vmem:[#allocation10 + $0x5b0] sm:$0xff]  ;;  %v2849_v35 = vcombine.low %v800_v20, %v804_v21 }
 0x21b   :  { %2422 = vmatprep.subr.bf16.mxu1 %v2896_v36  ;;  %2463 = vmatprep.subr.bf16.mxu0 %v3024_v37  ;;  %v2977_v36 = vcombine.low %v928_v22, %v932_v23  ;;  %v2842_v37 = vcombine.high %v792_v31, %v796_v32  ;;  %v2970_v38 = vcombine.high %v920_v33, %v924_v34  ;;  %v744_v21 = vld [vmem:[#allocation10 + $0x10] sm:$0xff] }
 0x21c   :  { %v748_v22 = vld [vmem:[#allocation10 + $0x30] sm:$0xff] }
 0x21d   :  { %v872_v23 = vld [vmem:[#allocation10 + $0x410] sm:$0xff] }
 0x21e   :  { %2423 = vmatpush2.bf16.msra.mxu1 %v2895_v42  ;;  %2464 = vmatpush2.bf16.msra.mxu0 %v3023_v43  ;;  %v916_v42 = vld [vmem:[#allocation10 + $0x570] sm:$0xff]  ;;  %v2841_v43 = vcombine.low %v792_v31, %v796_v32 }
 0x21f   :  { %2424 = vmatprep.subr.bf16.mxu1 %v2888_v44  ;;  %2465 = vmatprep.subr.bf16.mxu0 %v3016_v45  ;;  %v2969_v44 = vcombine.low %v920_v33, %v924_v34  ;;  %v2834_v45 = vcombine.high %v784_v39, %v788_v40  ;;  %v2962_v46 = vcombine.high %v912_v41, %v916_v42  ;;  %v864_v32 = vld [vmem:[#allocation10 + $0x3d0] sm:$0xff] }
 0x220   :  { %v868_v33 = vld [vmem:[#allocation10 + $0x3f0] sm:$0xff] }
 0x221   :  { %v992_v34 = vld [vmem:[#allocation10 + $0x7d0] sm:$0xff] }
 0x222   :  { %2425 = vmatpush2.bf16.msra.mxu1 %v2887_v52  ;;  %2466 = vmatpush2.bf16.msra.mxu0 %v3015_v53  ;;  %v908_v52 = vld [vmem:[#allocation10 + $0x530] sm:$0xff]  ;;  %v2833_v53 = vcombine.low %v784_v39, %v788_v40 }
 0x223   :  { %2426 = vmatprep.subr.bf16.mxu1 %v2880_v54  ;;  %2467 = vmatprep.subr.bf16.mxu0 %v3008_v55  ;;  %v2961_v54 = vcombine.low %v912_v41, %v916_v42  ;;  %v2826_v55 = vcombine.high %v776_v47, %v780_v48  ;;  %v2954_v56 = vcombine.high %v904_v50, %v908_v52  ;;  %v856_v40 = vld [vmem:[#allocation10 + $0x390] sm:$0xff] }
 0x224   :  { %v860_v41 = vld [vmem:[#allocation10 + $0x3b0] sm:$0xff] }
 0x225   :  { %v984_v42 = vld [vmem:[#allocation10 + $0x790] sm:$0xff] }
 0x226   :  { %2427 = vmatpush2.bf16.msra.mxu1 %v2879_v60  ;;  %2468 = vmatpush2.bf16.msra.mxu0 %v3007_v61  ;;  %v900_v60 = vld [vmem:[#allocation10 + $0x4f0] sm:$0xff]  ;;  %v2825_v61 = vcombine.low %v776_v47, %v780_v48 }
 0x227   :  { %2428 = vmatprep.subr.bf16.mxu1 %v2872_v62  ;;  %2469 = vmatprep.subr.bf16.mxu0 %v3000_v63  ;;  %v2953_v62 = vcombine.low %v904_v50, %v908_v52  ;;  %v2818_v63 = vcombine.high %v768_v57, %v772_v58  ;;  %v2946_v0 = vcombine.high %v896_v59, %v900_v60  ;;  %v848_v48 = vld [vmem:[#allocation10 + $0x350] sm:$0xff] }
 0x228   :  { %v852_v50 = vld [vmem:[#allocation10 + $0x370] sm:$0xff] }
 0x229   :  { %v976_v52 = vld [vmem:[#allocation10 + $0x750] sm:$0xff] }
 0x22a   :  { %2429 = vmatpush2.bf16.msra.mxu1 %v2871_v4  ;;  %2470 = vmatpush2.bf16.msra.mxu0 %v2999_v5  ;;  %v892_v4 = vld [vmem:[#allocation10 + $0x4b0] sm:$0xff]  ;;  %v2817_v5 = vcombine.low %v768_v57, %v772_v58 }
 0x22b   :  { %2430 = vmatprep.subr.bf16.mxu1 %v2864_v6  ;;  %2471 = vmatprep.subr.bf16.mxu0 %v2992_v7  ;;  %v2945_v6 = vcombine.low %v896_v59, %v900_v60  ;;  %v2810_v7 = vcombine.high %v760_v1, %v764_v2  ;;  %v2938_v8 = vcombine.high %v888_v3, %v892_v4  ;;  %v840_v58 = vld [vmem:[#allocation10 + $0x310] sm:$0xff] }
 0x22c   :  { %v844_v59 = vld [vmem:[#allocation10 + $0x330] sm:$0xff] }
 0x22d   :  { %v968_v60 = vld [vmem:[#allocation10 + $0x710] sm:$0xff] }
 0x22e   :  { %2431 = vmatpush2.bf16.msra.mxu1 %v2863_v16  ;;  %2472 = vmatpush2.bf16.msra.mxu0 %v2991_v17  ;;  %v884_v16 = vld [vmem:[#allocation10 + $0x470] sm:$0xff]  ;;  %v2809_v17 = vcombine.low %v760_v1, %v764_v2 }
 0x22f   :  { %2432 = vmatprep.subr.bf16.mxu1 %v2856_v18  ;;  %2473 = vmatprep.subr.bf16.mxu0 %v2984_v19  ;;  %v2937_v18 = vcombine.low %v888_v3, %v892_v4  ;;  %v2802_v19 = vcombine.high %v752_v9, %v756_v10  ;;  %v2930_v20 = vcombine.high %v880_v11, %v884_v16  ;;  %v832_v2 = vld [vmem:[#allocation10 + $0x2d0] sm:$0xff] }
 0x230   :  { %v836_v3 = vld [vmem:[#allocation10 + $0x2f0] sm:$0xff] }
 0x231   :  { %v960_v4 = vld [vmem:[#allocation10 + $0x6d0] sm:$0xff] }
 0x232   :  { %2433 = vmatpush2.bf16.msra.mxu1 %v2855_v24  ;;  %2474 = vmatpush2.bf16.msra.mxu0 %v2983_v25  ;;  %v876_v24 = vld [vmem:[#allocation10 + $0x430] sm:$0xff]  ;;  %v2801_v25 = vcombine.low %v752_v9, %v756_v10 }
 0x233   :  { %2484 = vmatprep.subr.bf16.mxu1 %v2850_v26  ;;  %2525 = vmatprep.subr.bf16.mxu0 %v2978_v29  ;;  %v2929_v26 = vcombine.low %v880_v11, %v884_v16  ;;  %v2794_v29 = vcombine.high %v744_v21, %v748_v22  ;;  %v2922_v31 = vcombine.high %v872_v23, %v876_v24  ;;  %v824_v10 = vld [vmem:[#allocation10 + $0x290] sm:$0xff] }
 0x234   :  { %v828_v11 = vld [vmem:[#allocation10 + $0x2b0] sm:$0xff] }
 0x235   :  { %2435 = vmatmul.mubr.bf16.vlgmr.msra.gmra.mxu1 %v3407_v14  ;;  %2476 = vmatmul.mubr.bf16.vlgmr.msra.gmra.mxu0 %v3409_v15  ;;  %v952_v16 = vld [vmem:[#allocation10 + $0x690] sm:$0xff] }
 0x236   :  { %2485 = vmatpush1.bf16.msra.mxu1 %v2849_v35  ;;  %2516 = vmatprep.mubr.bf16.mxu1 %v3403_v12  ;;  %v996_v35 = vld [vmem:[#allocation10 + $0x7f0] sm:$0xff] }
 0x237   :  { %2526 = vmatpush1.bf16.msra.mxu0 %v2977_v36  ;;  %2557 = vmatprep.mubr.bf16.mxu0 %v3405_v13  ;;  %v2793_v36 = vcombine.low %v744_v21, %v748_v22  ;;  %v3042_v39 = vcombine.high %v992_v34, %v996_v35  ;;  %v816_v22 = vld [vmem:[#allocation10 + $0x250] sm:$0xff] }
 0x238   :  { %2486 = vmatprep.subr.bf16.mxu1 %v2842_v37  ;;  %2527 = vmatprep.subr.bf16.mxu0 %v2970_v38  ;;  %v2921_v37 = vcombine.low %v872_v23, %v876_v24  ;;  %v2914_v38 = vcombine.high %v864_v32, %v868_v33  ;;  %v820_v23 = vld [vmem:[#allocation10 + $0x270] sm:$0xff] }
 0x239   :  { %v944_v24 = vld [vmem:[#allocation10 + $0x650] sm:$0xff] }
 0x23a   :  { %2487 = vmatpush1.bf16.msra.mxu1 %v2841_v43  ;;  %v988_v43 = vld [vmem:[#allocation10 + $0x7b0] sm:$0xff] }
 0x23b   :  { %2528 = vmatpush1.bf16.msra.mxu0 %v2969_v44  ;;  %2488 = vmatprep.subr.bf16.mxu1 %v2834_v45  ;;  %v2913_v44 = vcombine.low %v864_v32, %v868_v33  ;;  %v3041_v45 = vcombine.low %v992_v34, %v996_v35  ;;  %v3034_v47 = vcombine.high %v984_v42, %v988_v43  ;;  %v808_v33 = vld [vmem:[#allocation10 + $0x210] sm:$0xff] }
 0x23c   :  { %2529 = vmatprep.subr.bf16.mxu0 %v2962_v46  ;;  %v2906_v46 = vcombine.high %v856_v40, %v860_v41  ;;  %v812_v34 = vld [vmem:[#allocation10 + $0x230] sm:$0xff] }
 0x23d   :  { %v936_v35 = vld [vmem:[#allocation10 + $0x610] sm:$0xff] }
 0x23e   :  { %2489 = vmatpush1.bf16.msra.mxu1 %v2833_v53  ;;  %v980_v53 = vld [vmem:[#allocation10 + $0x770] sm:$0xff] }
 0x23f   :  { %2530 = vmatpush1.bf16.msra.mxu0 %v2961_v54  ;;  %2490 = vmatprep.subr.bf16.mxu1 %v2826_v55  ;;  %v2905_v54 = vcombine.low %v856_v40, %v860_v41  ;;  %v3033_v55 = vcombine.low %v984_v42, %v988_v43  ;;  %v3026_v57 = vcombine.high %v976_v52, %v980_v53  ;;  %v801_v41 = vld [vmem:[#allocation10 + $0x1d8] sm:$0xff] }
 0x240   :  { %2531 = vmatprep.subr.bf16.mxu0 %v2954_v56  ;;  %v2898_v56 = vcombine.high %v848_v48, %v852_v50  ;;  %v805_v42 = vld [vmem:[#allocation10 + $0x1f8] sm:$0xff] }
 0x241   :  { %v929_v43 = vld [vmem:[#allocation10 + $0x5d8] sm:$0xff] }
 0x242   :  { %2491 = vmatpush1.bf16.msra.mxu1 %v2825_v61  ;;  %v972_v61 = vld [vmem:[#allocation10 + $0x730] sm:$0xff] }
 0x243   :  { %2532 = vmatpush1.bf16.msra.mxu0 %v2953_v62  ;;  %2492 = vmatprep.subr.bf16.mxu1 %v2818_v63  ;;  %v2897_v62 = vcombine.low %v848_v48, %v852_v50  ;;  %v3025_v63 = vcombine.low %v976_v52, %v980_v53  ;;  %v3018_v1 = vcombine.high %v968_v60, %v972_v61  ;;  %v793_v50 = vld [vmem:[#allocation10 + $0x198] sm:$0xff] }
 0x244   :  { %2533 = vmatprep.subr.bf16.mxu0 %v2946_v0  ;;  %v2890_v0 = vcombine.high %v840_v58, %v844_v59  ;;  %v797_v52 = vld [vmem:[#allocation10 + $0x1b8] sm:$0xff]  ;;  %v2851_v53 = vcombine.low %v801_v41, %v805_v42 }
 0x246   :  { %2493 = vmatpush1.bf16.msra.mxu1 %v2817_v5  ;;  %v964_v5 = vld [vmem:[#allocation10 + $0x6f0] sm:$0xff] }
 0x247   :  { %2534 = vmatpush1.bf16.msra.mxu0 %v2945_v6  ;;  %2494 = vmatprep.subr.bf16.mxu1 %v2810_v7  ;;  %v2889_v6 = vcombine.low %v840_v58, %v844_v59  ;;  %v3017_v7 = vcombine.low %v968_v60, %v972_v61  ;;  %v3010_v9 = vcombine.high %v960_v4, %v964_v5  ;;  %v785_v58 = vld [vmem:[#allocation10 + $0x158] sm:$0xff] }
 0x248   :  { %2535 = vmatprep.subr.bf16.mxu0 %v2938_v8  ;;  %v2882_v8 = vcombine.high %v832_v2, %v836_v3  ;;  %v789_v59 = vld [vmem:[#allocation10 + $0x178] sm:$0xff] }
 0x249   :  { %v913_v61 = vld [vmem:[#allocation10 + $0x558] sm:$0xff] }
 0x24a   :  { %2495 = vmatpush1.bf16.msra.mxu1 %v2809_v17  ;;  %v956_v17 = vld [vmem:[#allocation10 + $0x6b0] sm:$0xff] }
 0x24b   :  { %2536 = vmatpush1.bf16.msra.mxu0 %v2937_v18  ;;  %2496 = vmatprep.subr.bf16.mxu1 %v2802_v19  ;;  %v2881_v18 = vcombine.low %v832_v2, %v836_v3  ;;  %v3009_v19 = vcombine.low %v960_v4, %v964_v5  ;;  %v3002_v21 = vcombine.high %v952_v16, %v956_v17  ;;  %v777_v3 = vld [vmem:[#allocation10 + $0x118] sm:$0xff] }
 0x24c   :  { %2537 = vmatprep.subr.bf16.mxu0 %v2930_v20  ;;  %v2874_v20 = vcombine.high %v824_v10, %v828_v11  ;;  %v781_v4 = vld [vmem:[#allocation10 + $0x138] sm:$0xff] }
 0x24d   :  { %v905_v5 = vld [vmem:[#allocation10 + $0x518] sm:$0xff] }
 0x24e   :  { %2497 = vmatpush1.bf16.msra.mxu1 %v2801_v25  ;;  %v948_v25 = vld [vmem:[#allocation10 + $0x670] sm:$0xff] }
 0x24f   :  { %2538 = vmatpush1.bf16.msra.mxu0 %v2929_v26  ;;  %2498 = vmatprep.subr.bf16.mxu1 %v2794_v29  ;;  %v2873_v26 = vcombine.low %v824_v10, %v828_v11  ;;  %v3001_v29 = vcombine.low %v952_v16, %v956_v17  ;;  %v2994_v32 = vcombine.high %v944_v24, %v948_v25  ;;  %v769_v10 = vld [vmem:[#allocation10 + $0xd8] sm:$0xff] }
 0x250   :  { %2539 = vmatprep.subr.bf16.mxu0 %v2922_v31  ;;  %v2866_v31 = vcombine.high %v816_v22, %v820_v23  ;;  %v773_v11 = vld [vmem:[#allocation10 + $0xf8] sm:$0xff] }
 0x251   :  { %v897_v16 = vld [vmem:[#allocation10 + $0x4d8] sm:$0xff] }
 0x252   :  { %2499 = vmatpush1.bf16.msra.mxu1 %v2793_v36  ;;  %v940_v36 = vld [vmem:[#allocation10 + $0x630] sm:$0xff]  ;;  %v901_v17 = vld [vmem:[#allocation10 + $0x4f8] sm:$0xff] }
 0x253   :  { %2540 = vmatpush1.bf16.msra.mxu0 %v2921_v37  ;;  %2500 = vmatprep.subr.bf16.mxu1 %v2914_v38  ;;  %v2865_v37 = vcombine.low %v816_v22, %v820_v23  ;;  %v2993_v38 = vcombine.low %v944_v24, %v948_v25  ;;  %v2986_v40 = vcombine.high %v936_v35, %v940_v36  ;;  %v765_v22 = vld [vmem:[#allocation10 + $0xb8] sm:$0xff] }
 0x254   :  { %2541 = vmatprep.subr.bf16.mxu0 %v3042_v39  ;;  %v2858_v39 = vcombine.high %v808_v33, %v812_v34  ;;  %v889_v23 = vld [vmem:[#allocation10 + $0x498] sm:$0xff]  ;;  %v2819_v25 = vcombine.low %v769_v10, %v773_v11 }
 0x255   :  { %v893_v24 = vld [vmem:[#allocation10 + $0x4b8] sm:$0xff] }
 0x256   :  { %2501 = vmatpush2.bf16.msra.mxu1 %v2913_v44  ;;  %v933_v44 = vld [vmem:[#allocation10 + $0x5f8] sm:$0xff] }
 0x257   :  { %2542 = vmatpush2.bf16.msra.mxu0 %v3041_v45  ;;  %2502 = vmatprep.subr.bf16.mxu1 %v2906_v46  ;;  %v2857_v45 = vcombine.low %v808_v33, %v812_v34  ;;  %v2985_v46 = vcombine.low %v936_v35, %v940_v36  ;;  %v2980_v48 = vcombine.high %v929_v43, %v933_v44  ;;  %v757_v33 = vld [vmem:[#allocation10 + $0x78] sm:$0xff] }
 0x258   :  { %2543 = vmatprep.subr.bf16.mxu0 %v3034_v47  ;;  %v2852_v47 = vcombine.high %v801_v41, %v805_v42  ;;  %v881_v34 = vld [vmem:[#allocation10 + $0x458] sm:$0xff] }
 0x259   :  { %v885_v35 = vld [vmem:[#allocation10 + $0x478] sm:$0xff] }
 0x25a   :  { %2503 = vmatpush2.bf16.msra.mxu1 %v2905_v54  ;;  %v921_v54 = vld [vmem:[#allocation10 + $0x598] sm:$0xff] }
 0x25b   :  { %2544 = vmatpush2.bf16.msra.mxu0 %v3033_v55  ;;  %2504 = vmatprep.subr.bf16.mxu1 %v2898_v56  ;;  %v925_v55 = vld [vmem:[#allocation10 + $0x5b8] sm:$0xff]  ;;  %v2979_v56 = vcombine.low %v929_v43, %v933_v44 }
 0x25c   :  { %2545 = vmatprep.subr.bf16.mxu0 %v3026_v57  ;;  %v2844_v57 = vcombine.high %v793_v50, %v797_v52  ;;  %v2972_v60 = vcombine.high %v921_v54, %v925_v55  ;;  %v749_v41 = vld [vmem:[#allocation10 + $0x38] sm:$0xff] }
 0x25d   :  { %v873_v42 = vld [vmem:[#allocation10 + $0x418] sm:$0xff] }
 0x25e   :  { %2505 = vmatpush2.bf16.msra.mxu1 %v2897_v62  ;;  %v917_v62 = vld [vmem:[#allocation10 + $0x578] sm:$0xff] }
 0x25f   :  { %2546 = vmatpush2.bf16.msra.mxu0 %v3025_v63  ;;  %2506 = vmatprep.subr.bf16.mxu1 %v2890_v0  ;;  %v2843_v63 = vcombine.low %v793_v50, %v797_v52  ;;  %v2971_v0 = vcombine.low %v921_v54, %v925_v55  ;;  %v2964_v2 = vcombine.high %v913_v61, %v917_v62  ;;  %v877_v43 = vld [vmem:[#allocation10 + $0x438] sm:$0xff] }
 0x260   :  { %2547 = vmatprep.subr.bf16.mxu0 %v3018_v1  ;;  %v2836_v1 = vcombine.high %v785_v58, %v789_v59  ;;  %v869_v50 = vld [vmem:[#allocation10 + $0x3f8] sm:$0xff]  ;;  %v2923_v55 = vcombine.low %v873_v42, %v877_v43 }
 0x261   :  { %v993_v52 = vld [vmem:[#allocation10 + $0x7d8] sm:$0xff] }
 0x262   :  { %2507 = vmatpush2.bf16.msra.mxu1 %v2889_v6  ;;  %v909_v6 = vld [vmem:[#allocation10 + $0x538] sm:$0xff] }
 0x263   :  { %2548 = vmatpush2.bf16.msra.mxu0 %v3017_v7  ;;  %2508 = vmatprep.subr.bf16.mxu1 %v2882_v8  ;;  %v2835_v7 = vcombine.low %v785_v58, %v789_v59  ;;  %v2963_v8 = vcombine.low %v913_v61, %v917_v62  ;;  %v857_v58 = vld [vmem:[#allocation10 + $0x398] sm:$0xff] }
 0x264   :  { %2549 = vmatprep.subr.bf16.mxu0 %v3010_v9  ;;  %v2828_v9 = vcombine.high %v777_v3, %v781_v4  ;;  %v861_v59 = vld [vmem:[#allocation10 + $0x3b8] sm:$0xff] }
 0x265   :  { %v989_v61 = vld [vmem:[#allocation10 + $0x7b8] sm:$0xff] }
 0x266   :  { %2509 = vmatpush2.bf16.msra.mxu1 %v2881_v18  ;;  %v2955_v18 = vcombine.low %v905_v5, %v909_v6 }
 0x267   :  { %2550 = vmatpush2.bf16.msra.mxu0 %v3009_v19  ;;  %2510 = vmatprep.subr.bf16.mxu1 %v2874_v20  ;;  %v2820_v19 = vcombine.high %v769_v10, %v773_v11  ;;  %v2948_v20 = vcombine.high %v897_v16, %v901_v17  ;;  %v845_v10 = vld [vmem:[#allocation10 + $0x338] sm:$0xff] }
 0x268   :  { %2551 = vmatprep.subr.bf16.mxu0 %v3002_v21  ;;  %v761_v21 = vld [vmem:[#allocation10 + $0x98] sm:$0xff] }
 0x269   :  { %v2811_v36 = vcombine.low %v761_v21, %v765_v22  ;;  %v969_v11 = vld [vmem:[#allocation10 + $0x718] sm:$0xff] }
 0x26a   :  { %2511 = vmatpush2.bf16.msra.mxu1 %v2873_v26  ;;  %v2947_v26 = vcombine.low %v897_v16, %v901_v17  ;;  %v973_v16 = vld [vmem:[#allocation10 + $0x738] sm:$0xff] }
 0x26b   :  { %2552 = vmatpush2.bf16.msra.mxu0 %v3001_v29  ;;  %2512 = vmatprep.subr.bf16.mxu1 %v2866_v31  ;;  %v2812_v29 = vcombine.high %v761_v21, %v765_v22  ;;  %v2940_v31 = vcombine.high %v889_v23, %v893_v24  ;;  %v837_v21 = vld [vmem:[#allocation10 + $0x2f8] sm:$0xff] }
 0x26c   :  { %2553 = vmatprep.subr.bf16.mxu0 %v2994_v32  ;;  %v753_v32 = vld [vmem:[#allocation10 + $0x58] sm:$0xff] }
 0x26d   :  { %v2803_v44 = vcombine.low %v753_v32, %v757_v33  ;;  %v961_v22 = vld [vmem:[#allocation10 + $0x6d8] sm:$0xff] }
 0x26e   :  { %2513 = vmatpush2.bf16.msra.mxu1 %v2865_v37  ;;  %v2939_v37 = vcombine.low %v889_v23, %v893_v24  ;;  %v965_v23 = vld [vmem:[#allocation10 + $0x6f8] sm:$0xff] }
 0x26f   :  { %2554 = vmatpush2.bf16.msra.mxu0 %v2993_v38  ;;  %2514 = vmatprep.subr.bf16.mxu1 %v2858_v39  ;;  %v2804_v38 = vcombine.high %v753_v32, %v757_v33  ;;  %v2932_v39 = vcombine.high %v881_v34, %v885_v35  ;;  %v829_v32 = vld [vmem:[#allocation10 + $0x2b8] sm:$0xff] }
 0x270   :  { %2555 = vmatprep.subr.bf16.mxu0 %v2986_v40  ;;  %v745_v40 = vld [vmem:[#allocation10 + $0x18] sm:$0xff] }
 0x271   :  { %v2795_v54 = vcombine.low %v745_v40, %v749_v41  ;;  %v953_v33 = vld [vmem:[#allocation10 + $0x698] sm:$0xff] }
 0x272   :  { %2515 = vmatpush2.bf16.msra.mxu1 %v2857_v45  ;;  %v2931_v45 = vcombine.low %v881_v34, %v885_v35  ;;  %v957_v34 = vld [vmem:[#allocation10 + $0x6b8] sm:$0xff] }
 0x273   :  { %2556 = vmatpush2.bf16.msra.mxu0 %v2985_v46  ;;  %2566 = vmatprep.subr.bf16.mxu1 %v2852_v47  ;;  %v2796_v46 = vcombine.high %v745_v40, %v749_v41  ;;  %v2924_v47 = vcombine.high %v873_v42, %v877_v43  ;;  %v821_v40 = vld [vmem:[#allocation10 + $0x278] sm:$0xff] }
 0x274   :  { %2607 = vmatprep.subr.bf16.mxu0 %v2980_v48  ;;  %v865_v48 = vld [vmem:[#allocation10 + $0x3d8] sm:$0xff] }
 0x275   :  { %2517 = vmatmul.mubr.bf16.vlgmr.msra.gmra.mxu1 %v3407_v14  ;;  %v2915_v62 = vcombine.low %v865_v48, %v869_v50  ;;  %v945_v41 = vld [vmem:[#allocation10 + $0x658] sm:$0xff] }
 0x276   :  { %2558 = vmatmul.mubr.bf16.vlgmr.msra.gmra.mxu0 %v3409_v15  ;;  %2567 = vmatpush1.bf16.msra.mxu1 %v2851_v53  ;;  %v997_v53 = vld [vmem:[#allocation10 + $0x7f8] sm:$0xff] }
 0x277   :  { %2598 = vmatprep.mubr.bf16.mxu1 %v3403_v12  ;;  %2608 = vmatpush1.bf16.msra.mxu0 %v2979_v56  ;;  %v2956_v12 = vcombine.high %v905_v5, %v909_v6  ;;  %v2916_v56 = vcombine.high %v865_v48, %v869_v50  ;;  %v981_v5 = vld [vmem:[#allocation10 + $0x778] sm:$0xff]  ;;  %v2907_v6 = vcombine.low %v857_v58, %v861_v59 }
 0x278   :  { %2639 = vmatprep.mubr.bf16.mxu0 %v3405_v13  ;;  %2568 = vmatprep.subr.bf16.mxu1 %v2844_v57  ;;  %v2827_v13 = vcombine.low %v777_v3, %v781_v4  ;;  %v3044_v57 = vcombine.high %v993_v52, %v997_v53  ;;  %v853_v3 = vld [vmem:[#allocation10 + $0x378] sm:$0xff] }
 0x279   :  { %2609 = vmatprep.subr.bf16.mxu0 %v2972_v60  ;;  %v985_v60 = vld [vmem:[#allocation10 + $0x798] sm:$0xff] }
 0x27a   :  { %2569 = vmatpush1.bf16.msra.mxu1 %v2843_v63  ;;  %v3043_v63 = vcombine.low %v993_v52, %v997_v53  ;;  %v977_v4 = vld [vmem:[#allocation10 + $0x758] sm:$0xff] }
 0x27b   :  { %2610 = vmatpush1.bf16.msra.mxu0 %v2971_v0  ;;  %2570 = vmatprep.subr.bf16.mxu1 %v2836_v1  ;;  %v2908_v0 = vcombine.high %v857_v58, %v861_v59  ;;  %v3036_v1 = vcombine.high %v985_v60, %v989_v61  ;;  %v949_v42 = vld [vmem:[#allocation10 + $0x678] sm:$0xff] }
 0x27c   :  { %2611 = vmatprep.subr.bf16.mxu0 %v2964_v2  ;;  %v849_v2 = vld [vmem:[#allocation10 + $0x358] sm:$0xff] }
 0x27d   :  { %v2899_v17 = vcombine.low %v849_v2, %v853_v3  ;;  %v813_v48 = vld [vmem:[#allocation10 + $0x238] sm:$0xff] }
 0x27e   :  { %2571 = vmatpush1.bf16.msra.mxu1 %v2835_v7  ;;  %v3035_v7 = vcombine.low %v985_v60, %v989_v61  ;;  %v937_v50 = vld [vmem:[#allocation10 + $0x618] sm:$0xff] }
 0x27f   :  { %2612 = vmatpush1.bf16.msra.mxu0 %v2963_v8  ;;  %2572 = vmatprep.subr.bf16.mxu1 %v2828_v9  ;;  %v2900_v8 = vcombine.high %v849_v2, %v853_v3  ;;  %v3028_v9 = vcombine.high %v977_v4, %v981_v5  ;;  %v941_v52 = vld [vmem:[#allocation10 + $0x638] sm:$0xff] }
 0x280   :  { %2613 = vmatprep.subr.bf16.mxu0 %v2956_v12  ;;  %v841_v12 = vld [vmem:[#allocation10 + $0x318] sm:$0xff]  ;;  %v2987_v58 = vcombine.low %v937_v50, %v941_v52 }
 0x281   :  { %v2891_v24 = vcombine.low %v841_v12, %v845_v10  ;;  %v3428_v59 = vld [vmem:[%s3459_s6] sm:$0xff]  ;;  %s3326_s6 = smov [#allocation11]  }
 0x282   :  { %2573 = vmatpush1.bf16.msra.mxu1 %v2827_v13  ;;  %v3027_v13 = vcombine.low %v977_v4, %v981_v5  ;;  %v1003_v60 = vrot.slane %v3428_v59, %v3385_v28  ;;  %v1007_v61 = vrot.slane %v3428_v59, %v3391_v30  ;;  %v1011_v30 = vrot.slane %v3428_v59, %v322_v49  ;;  %s2698_s30 = sshll.u32 %s3326_s6, 4  ;;  %s2699_s30 = int_to_ptr.vmem [resolvable:$true] %s2698_s30 }
 0x283   :  { %2614 = vmatpush1.bf16.msra.mxu0 %v2955_v18  ;;  %2574 = vmatprep.subr.bf16.mxu1 %v2820_v19  ;;  %v2892_v18 = vcombine.high %v841_v12, %v845_v10  ;;  %v3020_v19 = vcombine.high %v969_v11, %v973_v16  ;;  %v1018_v49 = vsub.s32 4, %v3382_v27  ;;  %s3286_s8 = scalar_lea.vmem %s2699_s30, 512  ;;  %p3291_p12 = scmp.lt.s32.totalorder %s2699_s30, %s2699_s30 }
 0x284   :  { %2615 = vmatprep.subr.bf16.mxu0 %v2948_v20  ;;  %v833_v20 = vld [vmem:[#allocation10 + $0x2d8] sm:$0xff]  ;;  %p3287_p11 = scmp.ne.s32.totalorder %s2699_s30, %s3286_s8  ;;  %p3292_p13 = scmp.lt.s32.totalorder %s3286_s8, %s3286_s8 }
 0x285   :  { %v2883_v35 = vcombine.low %v833_v20, %v837_v21 }
 0x286   :  { %2575 = vmatpush1.bf16.msra.mxu1 %v2819_v25  ;;  %v3019_v25 = vcombine.low %v969_v11, %v973_v16  ;;  %p3293_p0 = por %p3292_p13, %p3291_p12 }
 0x287   :  { %2616 = vmatpush1.bf16.msra.mxu0 %v2947_v26  ;;  %2576 = vmatprep.subr.bf16.mxu1 %v2812_v29  ;;  %v2884_v26 = vcombine.high %v833_v20, %v837_v21  ;;  %v3012_v29 = vcombine.high %v961_v22, %v965_v23 }
 0x288   :  { %2617 = vmatprep.subr.bf16.mxu0 %v2940_v31  ;;  %v825_v31 = vld [vmem:[#allocation10 + $0x298] sm:$0xff]  ;;  %p3294_p1 = pnand %p3293_p0, %p3287_p11 }
 0x289   :  { %v2875_v43 = vcombine.low %v825_v31, %v829_v32 }
 0x28a   :  { %2577 = vmatpush1.bf16.msra.mxu1 %v2811_v36  ;;  %v3011_v36 = vcombine.low %v961_v22, %v965_v23 }
 0x28b   :  { %2618 = vmatpush1.bf16.msra.mxu0 %v2939_v37  ;;  %2578 = vmatprep.subr.bf16.mxu1 %v2804_v38  ;;  %v2876_v37 = vcombine.high %v825_v31, %v829_v32  ;;  %v3004_v38 = vcombine.high %v953_v33, %v957_v34  ;;  %v1019_v31 = vrot.slane %v3428_v59, %v1018_v49 }
 0x28c   :  { %2619 = vmatprep.subr.bf16.mxu0 %v2932_v39  ;;  %v817_v39 = vld [vmem:[#allocation10 + $0x258] sm:$0xff] }
 0x28d   :  { %v2867_v53 = vcombine.low %v817_v39, %v821_v40 }
 0x28e   :  { %2579 = vmatpush1.bf16.msra.mxu1 %v2803_v44  ;;  %v3003_v44 = vcombine.low %v953_v33, %v957_v34 }
 0x28f   :  { %2620 = vmatpush1.bf16.msra.mxu0 %v2931_v45  ;;  %2580 = vmatprep.subr.bf16.mxu1 %v2796_v46  ;;  %v2868_v45 = vcombine.high %v817_v39, %v821_v40  ;;  %v2996_v46 = vcombine.high %v945_v41, %v949_v42 }
 0x290   :  { %2621 = vmatprep.subr.bf16.mxu0 %v2924_v47  ;;  %v809_v47 = vld [vmem:[#allocation10 + $0x218] sm:$0xff] }
 0x292   :  { %2581 = vmatpush1.bf16.msra.mxu1 %v2795_v54  ;;  %v2995_v54 = vcombine.low %v945_v41, %v949_v42 }
 0x293   :  { %2622 = vmatpush1.bf16.msra.mxu0 %v2923_v55  ;;  %2582 = vmatprep.subr.bf16.mxu1 %v2916_v56  ;;  %v2860_v55 = vcombine.high %v809_v47, %v813_v48  ;;  %v2988_v56 = vcombine.high %v937_v50, %v941_v52  ;;  %v1030_v50 = vsub.s32 7, %v3382_v27 }
 0x294   :  { %2623 = vmatprep.subr.bf16.mxu0 %v3044_v57  ;;  %v2859_v57 = vcombine.low %v809_v47, %v813_v48  ;;  %v1026_v48 = vsub.s32 6, %v3382_v27 }
 0x296   :  { %2583 = vmatpush2.bf16.msra.mxu1 %v2915_v62  ;;  %v1027_v52 = vrot.slane %v3428_v59, %v1026_v48 }
 0x297   :  { %2624 = vmatpush2.bf16.msra.mxu0 %v3043_v63  ;;  %2584 = vmatprep.subr.bf16.mxu1 %v2908_v0 }
 0x298   :  { %2625 = vmatprep.subr.bf16.mxu0 %v3036_v1 }
 0x29a   :  { %2585 = vmatpush2.bf16.msra.mxu1 %v2907_v6 }
 0x29b   :  { %2626 = vmatpush2.bf16.msra.mxu0 %v3035_v7  ;;  %2586 = vmatprep.subr.bf16.mxu1 %v2900_v8 }
 0x29c   :  { %2627 = vmatprep.subr.bf16.mxu0 %v3028_v9 }
 0x29e   :  { %2587 = vmatpush2.bf16.msra.mxu1 %v2899_v17 }
 0x29f   :  { %2628 = vmatpush2.bf16.msra.mxu0 %v3027_v13  ;;  %2588 = vmatprep.subr.bf16.mxu1 %v2892_v18 }
 0x2a0   :  { %2629 = vmatprep.subr.bf16.mxu0 %v3020_v19 }
 0x2a2   :  { %2589 = vmatpush2.bf16.msra.mxu1 %v2891_v24 }
 0x2a3   :  { %2630 = vmatpush2.bf16.msra.mxu0 %v3019_v25  ;;  %2590 = vmatprep.subr.bf16.mxu1 %v2884_v26 }
 0x2a4   :  { %2631 = vmatprep.subr.bf16.mxu0 %v3012_v29 }
 0x2a6   :  { %2591 = vmatpush2.bf16.msra.mxu1 %v2883_v35 }
 0x2a7   :  { %2632 = vmatpush2.bf16.msra.mxu0 %v3011_v36  ;;  %2592 = vmatprep.subr.bf16.mxu1 %v2876_v37 }
 0x2a8   :  { %2633 = vmatprep.subr.bf16.mxu0 %v3004_v38 }
 0x2aa   :  { %2593 = vmatpush2.bf16.msra.mxu1 %v2875_v43 }
 0x2ab   :  { %2634 = vmatpush2.bf16.msra.mxu0 %v3003_v44  ;;  %2594 = vmatprep.subr.bf16.mxu1 %v2868_v45 }
 0x2ac   :  { %2635 = vmatprep.subr.bf16.mxu0 %v2996_v46 }
 0x2ae   :  { %2595 = vmatpush2.bf16.msra.mxu1 %v2867_v53  ;;  %v1031_v53 = vrot.slane %v3428_v59, %v1030_v50 }
 0x2af   :  { %2636 = vmatpush2.bf16.msra.mxu0 %v2995_v54  ;;  %2596 = vmatprep.subr.bf16.mxu1 %v2860_v55 }
 0x2b0   :  { %2637 = vmatprep.subr.bf16.mxu0 %v2988_v56 }
 0x2b2   :  { %2597 = vmatpush2.bf16.msra.mxu1 %v2859_v57 }
 0x2b3   :  { %2638 = vmatpush2.bf16.msra.mxu0 %v2987_v58 }
 0x2b5   :  { %2599 = vmatmul.mubr.bf16.vlgmr.msra.gmra.mxu1 %v3407_v14  ;;  %v2354_v62 = vpop.f32.mrf.mxu1  ;;  %v2395_v63 = vpop.f32.mrf.mxu0  ;;  %v1015_v14 = vrot.slane %v3428_v59, %v326_v51  ;;  %v1022_v51 = vsub.s32 5, %v3382_v27 }
 0x2b6   :  { %2640 = vmatmul.mubr.bf16.vlgmr.msra.gmra.mxu0 %v3409_v15  ;;  %v2355_v0 = vadd.f32 %v2354_v62, %v1003_v60 }
 0x2b7   :  { %v2356_v1 = vpop.f32.mrf.mxu1  ;;  %v2397_v2 = vpop.f32.mrf.mxu0  ;;  %v1023_v32 = vrot.slane %v3428_v59, %v1022_v51 }
 0x2b8   :  { %v2396_v3 = vadd.f32 %v2395_v63, %v2355_v0  ;;  %v2357_v4 = vadd.f32 %v2356_v1, %v1007_v61 }
 0x2b9   :  { %v2358_v5 = vpop.f32.mrf.mxu1  ;;  %v2399_v6 = vpop.f32.mrf.mxu0 }
 0x2ba   :  { %v2398_v7 = vadd.f32 %v2397_v2, %v2357_v4  ;;  %v2648_v9 = vmax.f32 %v2396_v3, 0.0 }
 0x2bb   :  { %v2359_v8 = vpop.f32.mrf.mxu1  ;;  %v2400_v28 = vpop.f32.mrf.mxu0 }
 0x2bc   :  { %v2649_v12 = vmax.f32 %v2398_v7, 0.0 }
 0x2be   :  { %v3049_v10 = vpack.c.bf16 %v2649_v12, %v2648_v9 }
 0x2c0   :  { %2688 = vst [vmem:[#allocation11] sm:$0xff] %v3049_v10 }
 0x2f5   :  { %v2436_v15 = vpop.f32.mrf.mxu1  ;;  %v2477_v11 = vpop.f32.mrf.mxu0 }
 0x2f6   :  { %v2437_v16 = vadd.f32 %v2436_v15, %v1011_v30 }
 0x2f7   :  { %v2438_v17 = vpop.f32.mrf.mxu1  ;;  %v2479_v13 = vpop.f32.mrf.mxu0 }
 0x2f8   :  { %v2478_v18 = vadd.f32 %v2477_v11, %v2437_v16  ;;  %v2439_v19 = vadd.f32 %v2438_v17, %v1015_v14 }
 0x2f9   :  { %v2440_v20 = vpop.f32.mrf.mxu1  ;;  %v2481_v21 = vpop.f32.mrf.mxu0 }
 0x2fa   :  { %v2480_v22 = vadd.f32 %v2479_v13, %v2439_v19  ;;  %v2650_v25 = vmax.f32 %v2478_v18, 0.0 }
 0x2fb   :  { %v2441_v23 = vpop.f32.mrf.mxu1  ;;  %v2482_v24 = vpop.f32.mrf.mxu0 }
 0x2fc   :  { %v2651_v26 = vmax.f32 %v2480_v22, 0.0 }
 0x2fe   :  { %v3050_v29 = vpack.c.bf16 %v2651_v26, %v2650_v25 }
 0x300   :  { %2689 = vst [vmem:[#allocation11 + $0x8] sm:$0xff] %v3050_v29 }
 0x335   :  { %v2518_v33 = vpop.f32.mrf.mxu1 }
 0x336   :  { %v2519_v34 = vadd.f32 %v2518_v33, %v1019_v31  ;;  %v2559_v35 = vpop.f32.mrf.mxu0 }
 0x337   :  { %v2520_v36 = vpop.f32.mrf.mxu1 }
 0x338   :  { %v2560_v37 = vadd.f32 %v2559_v35, %v2519_v34  ;;  %v2521_v38 = vadd.f32 %v2520_v36, %v1023_v32  ;;  %v2561_v39 = vpop.f32.mrf.mxu0 }
 0x339   :  { %v2522_v40 = vpop.f32.mrf.mxu1 }
 0x33a   :  { %v2562_v41 = vadd.f32 %v2561_v39, %v2521_v38  ;;  %v2563_v42 = vpop.f32.mrf.mxu0  ;;  %v2652_v44 = vmax.f32 %v2560_v37, 0.0 }
 0x33b   :  { %v2523_v43 = vpop.f32.mrf.mxu1 }
 0x33c   :  { %v2653_v45 = vmax.f32 %v2562_v41, 0.0  ;;  %v2564_v46 = vpop.f32.mrf.mxu0 }
 0x33e   :  { %v3051_v47 = vpack.c.bf16 %v2653_v45, %v2652_v44 }
 0x340   :  { %2690 = vst [vmem:[#allocation11 + $0x10] sm:$0xff] %v3051_v47 }
 0x375   :  { %v2600_v54 = vpop.f32.mrf.mxu1 }
 0x376   :  { %v2601_v55 = vadd.f32 %v2600_v54, %v1027_v52  ;;  %v2641_v56 = vpop.f32.mrf.mxu0 }
 0x377   :  { %v2602_v57 = vpop.f32.mrf.mxu1 }
 0x378   :  { %v2642_v58 = vadd.f32 %v2641_v56, %v2601_v55  ;;  %v2603_v60 = vadd.f32 %v2602_v57, %v1031_v53  ;;  %v2643_v61 = vpop.f32.mrf.mxu0 }
 0x379   :  { %v2604_v62 = vpop.f32.mrf.mxu1 }
 0x37a   :  { %v2644_v63 = vadd.f32 %v2643_v61, %v2603_v60  ;;  %v2645_v0 = vpop.f32.mrf.mxu0  ;;  %v2654_v2 = vmax.f32 %v2642_v58, 0.0 }
 0x37b   :  { %v2605_v1 = vpop.f32.mrf.mxu1 }
 0x37c   :  { %v2655_v3 = vmax.f32 %v2644_v63, 0.0  ;;  %v2646_v27 = vpop.f32.mrf.mxu0 }
 0x37e   :  { %v3052_v4 = vpack.c.bf16 %v2655_v3, %v2654_v2 }
 0x380   :  { %2691 = vst [vmem:[#allocation11 + $0x18] sm:$0xff] %v3052_v4 }
 0x381   :  { %3297 = shalt.err (!%p3294_p1)
}
 0x382   :  { %2701 = dma.vmem_to_hbm [thread:$0]  %s2699_s30, 512, %s3460_s7, [#allocation4]  }
 0x383   :  { %3312 = dma.done.wait [#allocation4], 512  }
 0x384   :  { %3313 = vsyncadd [#allocation4], 4294966784 }
 0x385   :  { %2705 = vsyncpa [#allocation3], 1 }
 0x386   :  { %2706 = vsyncpa [#allocation6], 1 }
 0x387   :  { %2707 = vsyncpa [#allocation9], 1 }
 0x388   :  { %2708 = vsyncpa [#allocation4], 1 }

</bundles_post_ra>
